<compile_context>
chip_gen: v7x
topology: tpu7x:2x2x1
jax: 0.10.0
libtpu: 0.0.40
codegen_flags: <defaults>
</compile_context>

<pallas_src>
import functools
import math

import jax
import jax.numpy as jnp
from jax.experimental import pallas as pl
from jax.experimental.pallas import tpu as pltpu


_CHANNEL_NAMES = ('4', '8', '16', '32', '64', '128', '256', '512', '1024')
_EPS = 1e-8


def _leaky_relu(v):
    # LeakyReLU(negative_slope=0.2) == max(v, 0.2*v)
    return jnp.maximum(v, 0.2 * v)


def modulate_weight(weight, mod_w, mod_b, style, eps=_EPS):
    """SinStyleMod.forward_bmm weight construction (point-independent glue).

    weight: (Cin, Cout); mod_w: (Cin, S); mod_b: (Cin,); style: (B, S)
    returns per-batch demodulated weight of shape (B, Cin, Cout).
    """
    s = style @ mod_w.T + mod_b                               # (B, Cin)
    w = weight[None, :, :] * (s + 1.0)[:, :, None]            # (B, Cin, Cout)
    demod = jax.lax.rsqrt(jnp.sum(w * w, axis=1) + eps)       # (B, Cout)
    return w * demod[:, None, :]


# -----------------------------------------------------------------------------
# Pallas kernel: one grid step = (one batch element, one lane-dense point tile).
# Activations are channels-first (C, TN); weights are (Cout, Cin).
# -----------------------------------------------------------------------------
def _cips_kernel(x_ref, w0_ref, wr_ref, wrgb_ref, b_ref, o_ref, *, n_blocks):
    f32 = jnp.float32
    wdt = w0_ref.dtype                     # bf16 or f32 (MXU input dtype)

    x = x_ref[0]                           # (Cin, TN), lane-dense

    # ---- block 0 (no skip, no rgb) ----
    h = _leaky_relu(jnp.dot(w0_ref[0], x, preferred_element_type=f32))
    h = _leaky_relu(jnp.dot(wr_ref[0, 0], h.astype(wdt),
                            preferred_element_type=f32))

    rgb = None
    k = 1
    for blk in range(1, n_blocks):
        h_in = h                                              # f32 (H, TN)
        h = _leaky_relu(jnp.dot(wr_ref[0, k], h.astype(wdt),
                                preferred_element_type=f32))
        h = _leaky_relu(jnp.dot(wr_ref[0, k + 1], h.astype(wdt),
                                preferred_element_type=f32))
        k += 2
        if blk >= 4:                                          # SkipLayer (H == H)
            h = h + h_in
        if blk >= 3:                                          # (head-fused) ToRGB
            r = jnp.dot(wrgb_ref[blk - 3], h, preferred_element_type=f32)
            rgb = r if rgb is None else rgb + r

    out = rgb + b_ref[...]                                    # (out_ch, 1) bcast
    o_ref[0] = jnp.tanh(out).astype(o_ref.dtype)


# -----------------------------------------------------------------------------
# Wrapper
# -----------------------------------------------------------------------------
def cips_forward(x, style_dict, params, *, img_size=1024, name_prefix='inr',
                 tile_n=512, io_dtype=None, single_buffer_weights=False):
    """
    x:          (B, num_points, input_dim) float32
    style_dict: {f'{name_prefix}_sin_block_{name}_{0|1}': (B, style_dim)}
    params:     from init_params().
    returns:    (B, num_points, 3)   (or pre_rgb_dim channels if pre_rgb_dim<=3)
    """
    B, N, Din = x.shape
    if io_dtype is None:
        io_dtype = x.dtype

    names = _CHANNEL_NAMES
    stop = str(2 ** int(math.log2(img_size)))
    assert stop in names, f"bad img_size {img_size}"
    n_blocks = names.index(stop) + 1
    assert n_blocks >= 4, "CIPSNet only produces rgb for img_size >= 32"
    assert n_blocks <= len(params['blocks'])

    H = params['blocks'][0]['w1'].shape[1]
    Rp = params['to_rgb_w'].shape[1]
    has_head = Rp > 3
    out_ch = 3 if has_head else Rp
    n_rgb = n_blocks - 3

    # ---- point-independent style glue (plain JAX): per-batch demodulated,
    #      transposed weights for every SinStyleMod layer. ----
    def mod_T(blk, which):
        p = params['blocks'][blk]
        st = style_dict[f'{name_prefix}_sin_block_{names[blk]}_{which}']
        w = p['w1'] if which == 0 else p['w2']
        mw = p['modw1'] if which == 0 else p['modw2']
        mb = p['modb1'] if which == 0 else p['modb2']
        wb = modulate_weight(w, mw, mb, st)                   # (B, Cin, Cout)
        return jnp.transpose(wb, (0, 2, 1))                   # (B, Cout, Cin)

    w0 = mod_T(0, 0)                                          # (B, H, Din)
    w_rest = jnp.stack(
        [mod_T(0, 1)] + [mod_T(b, w) for b in range(1, n_blocks) for w in (0, 1)],
        axis=1)                                               # (B, 2*L-1, H, H)
    nW = w_rest.shape[1]

    # ---- fold the (linear) head into the ToRGB weights / biases ----
    w_rgb = params['to_rgb_w'][3:n_blocks]                    # (n_rgb, Rp, H)
    b_sum = jnp.sum(params['to_rgb_b'][3:n_blocks], axis=0)   # (Rp,)
    if has_head:
        w_rgb = jnp.einsum('or,nrh->noh', params['head_w'], w_rgb)  # (n_rgb,3,H)
        b_sum = params['head_w'] @ b_sum + params['head_b']          # (3,)
    b_fused = b_sum.reshape(out_ch, 1).astype(jnp.float32)
    w_rgb = w_rgb.astype(jnp.float32)

    # ---- channels-first, lane-dense layout; pad points to a tile multiple ----
    tile_n = max(128, min(tile_n, pl.cdiv(N, 128) * 128))
    Np = pl.cdiv(N, tile_n) * tile_n
    x_cf = jnp.transpose(x, (0, 2, 1))                        # (B, Din, N)
    if Np != N:
        x_cf = jnp.pad(x_cf, ((0, 0), (0, 0), (0, Np - N)))

    x_cf = x_cf.astype(io_dtype)
    w0 = w0.astype(io_dtype)
    w_rest = w_rest.astype(io_dtype)

    grid = (B, Np // tile_n)

    def w_spec(shape, index_map):
        # Weight operands. Optionally single-buffer to reclaim VMEM (v7x) at
        # production hidden_dim; their DMA is only exposed once per batch.
        kwargs = {}
        if single_buffer_weights:
            kwargs['pipeline_mode'] = pl.Buffered(1)
        return pl.BlockSpec(shape, index_map, **kwargs)

    in_specs = [
        pl.BlockSpec((1, Din, tile_n), lambda b, n: (b, 0, n)),       # x
        w_spec((1, H, Din), lambda b, n: (b, 0, 0)),                  # block0.mod1
        w_spec((1, nW, H, H), lambda b, n: (b, 0, 0, 0)),             # other mods
        w_spec((n_rgb, out_ch, H), lambda b, n: (0, 0, 0)),           # fused ToRGB
        w_spec((out_ch, 1), lambda b, n: (0, 0)),                     # fused bias
    ]
    operands = [x_cf, w0, w_rest, w_rgb, b_fused]

    kernel = functools.partial(_cips_kernel, n_blocks=n_blocks)

    out_cf = pl.pallas_call(
        kernel,
        out_shape=jax.ShapeDtypeStruct((B, out_ch, Np), io_dtype),
        grid=grid,
        in_specs=in_specs,
        out_specs=pl.BlockSpec((1, out_ch, tile_n), lambda b, n: (b, 0, n)),
        compiler_params=pltpu.CompilerParams(
            # Both axes are independent: with 2 TensorCores (v7x) either the
            # batch or the point-tile axis can be sharded across cores.
            dimension_semantics=("parallel", "parallel")),
    )(*operands)

    return jnp.transpose(out_cf[:, :, :N], (0, 2, 1))             # (B, N, out_ch)


# -----------------------------------------------------------------------------
# Deterministic parameter init (mirrors the PyTorch module's parameter shapes)
# -----------------------------------------------------------------------------
def init_params(key, input_dim, style_dim, hidden_dim, pre_rgb_dim, n_blocks):
    def kaiming(k, fan_in, shape, a=0.2):
        std = math.sqrt(2.0 / (1.0 + a * a) / fan_in)
        return std * jax.random.normal(k, shape, jnp.float32)

    keys = iter(jax.random.split(key, 8 * n_blocks + 8))
    blocks = []
    in_dim = input_dim
    for _ in range(n_blocks):
        blocks.append(dict(
            w1=kaiming(next(keys), in_dim, (in_dim, hidden_dim)),
            modw1=kaiming(next(keys), style_dim, (in_dim, style_dim)),
            modb1=0.01 * jax.random.normal(next(keys), (in_dim,), jnp.float32),
            w2=kaiming(next(keys), hidden_dim, (hidden_dim, hidden_dim)),
            modw2=kaiming(next(keys), style_dim, (hidden_dim, style_dim)),
            modb2=0.01 * jax.random.normal(next(keys), (hidden_dim,), jnp.float32),
        ))
        in_dim = hidden_dim
    to_rgb_w = jnp.stack([kaiming(next(keys), hidden_dim, (pre_rgb_dim, hidden_dim))
                          for _ in range(n_blocks)])
    to_rgb_b = 0.01 * jax.random.normal(next(keys), (n_blocks, pre_rgb_dim),
                                        jnp.float32)
    head_w = kaiming(next(keys), pre_rgb_dim, (3, pre_rgb_dim))
    head_b = jnp.zeros((3,), jnp.float32)
    return dict(blocks=blocks, to_rgb_w=to_rgb_w, to_rgb_b=to_rgb_b,
                head_w=head_w, head_b=head_b)


# -----------------------------------------------------------------------------
# Pure-JAX reference (follows the PyTorch forward structure directly)
# -----------------------------------------------------------------------------
def cips_reference(x, style_dict, params, *, img_size, name_prefix='inr'):
    names = _CHANNEL_NAMES
    stop = str(2 ** int(math.log2(img_size)))
    n_blocks = names.index(stop) + 1
    Rp = params['to_rgb_w'].shape[1]

    def mod_bmm(h, blk, which):
        p = params['blocks'][blk]
        st = style_dict[f'{name_prefix}_sin_block_{names[blk]}_{which}']
        w = p['w1'] if which == 0 else p['w2']
        mw = p['modw1'] if which == 0 else p['modw2']
        mb = p['modb1'] if which == 0 else p['modb2']
        wb = modulate_weight(w, mw, mb, st)                   # (B, Cin, Cout)
        return jnp.einsum('bnc,bco->bno', h, wb)

    h = x
    rgb = 0.0
    for blk in range(n_blocks):
        h_orig = h
        h = _leaky_relu(mod_bmm(h, blk, 0))
        h = _leaky_relu(mod_bmm(h, blk, 1))
        if blk >= 4 and h.shape[-1] == h_orig.shape[-1]:
            h = h + h_orig
        if blk >= 3:
            rgb = (jnp.einsum('bnh,rh->bnr', h, params['to_rgb_w'][blk])
                   + params['to_rgb_b'][blk] + rgb)
    if Rp > 3:
        rgb = jnp.einsum('bnr,or->bno', rgb, params['head_w']) + params['head_b']
    return jnp.tanh(rgb)


if __name__ == "__main__":
    B, N = 2, 1000                      # N deliberately NOT a tile multiple
    INPUT_DIM, STYLE_DIM = 3, 16
    HIDDEN_DIM, PRE_RGB_DIM = 32, 8
    IMG_SIZE = 64                       # -> blocks '4','8','16','32','64' (5)

    names = _CHANNEL_NAMES
    n_blocks = names.index(str(2 ** int(math.log2(IMG_SIZE)))) + 1

    key = jax.random.PRNGKey(0)
    kx, kp, ks = jax.random.split(key, 3)
    x = jax.random.normal(kx, (B, N, INPUT_DIM), jnp.float32)
    params = init_params(kp, INPUT_DIM, STYLE_DIM, HIDDEN_DIM, PRE_RGB_DIM,
                         n_blocks)

    style_keys = jax.random.split(ks, 2 * n_blocks)
    style_dict = {}
    for i in range(n_blocks):
        style_dict[f'inr_sin_block_{names[i]}_0'] = jax.random.normal(
            style_keys[2 * i], (B, STYLE_DIM), jnp.float32)
        style_dict[f'inr_sin_block_{names[i]}_1'] = jax.random.normal(
            style_keys[2 * i + 1], (B, STYLE_DIM), jnp.float32)

    # f32 path (default tile_n=512; N=1000 is padded to 1024 -> grid (2, 2))
    out = cips_forward(x, style_dict, params, img_size=IMG_SIZE)
    out = jax.block_until_ready(out)

    ref = cips_reference(x, style_dict, params, img_size=IMG_SIZE)
    assert out.shape == (B, N, 3), out.shape
    err = float(jnp.max(jnp.abs(out.astype(jnp.float32) - ref)))
    assert err < 2e-4, err

    # bf16 I/O variant (v6e/v7x): halves HBM traffic for x / output / per-batch
    # modulated weights; MXU accumulation and all elementwise math stay f32.
    out_bf16 = cips_forward(x, style_dict, params, img_size=IMG_SIZE,
                            io_dtype=jnp.bfloat16)
    out_bf16 = jax.block_until_ready(out_bf16)
    assert out_bf16.shape == (B, N, 3)
    assert bool(jnp.all(jnp.isfinite(out_bf16.astype(jnp.float32))))

    print("KERNEL_OK")
</pallas_src>

<mosaic_0001>
module attributes {stable_mosaic.version = 11 : i64} {
  func.func @_cips_kernel(%arg0: i32, %arg1: i32, %arg2: memref<1x3x512xf32, #tpu.memory_space<vmem>>, %arg3: memref<1x32x3xf32, #tpu.memory_space<vmem>>, %arg4: memref<1x9x32x32xf32, #tpu.memory_space<vmem>>, %arg5: memref<2x3x32xf32, #tpu.memory_space<vmem>>, %arg6: memref<3x1xf32, #tpu.memory_space<vmem>>, %arg7: memref<1x3x512xf32, #tpu.memory_space<vmem>>) attributes {dimension_semantics = [#tpu.dimension_semantics<parallel>, #tpu.dimension_semantics<parallel>], iteration_bounds = array<i64: 2, 2>, scalar_prefetch = 0 : i64, scratch_operands = 0 : i64, tpu.core_type = #tpu.core_type<tc>, window_params = [{transform_indices = @transform_0, window_bounds = array<i64: 1, 3, 512>}, {transform_indices = @transform_1, window_bounds = array<i64: 1, 32, 3>}, {transform_indices = @transform_2, window_bounds = array<i64: 1, 9, 32, 32>}, {pipeline_mode = #tpu.pipeline_mode<synchronous>, transform_indices = @transform_3, window_bounds = array<i64: 2, 3, 32>}, {pipeline_mode = #tpu.pipeline_mode<synchronous>, transform_indices = @transform_4, window_bounds = array<i64: 3, 1>}, {transform_indices = @transform_5, window_bounds = array<i64: 1, 3, 512>}]} {
    %c0 = arith.constant 0 : index
    %c0_0 = arith.constant 0 : index
    %c0_1 = arith.constant 0 : index
    %0 = vector.load %arg2[%c0, %c0_0, %c0_1] : memref<1x3x512xf32, #tpu.memory_space<vmem>>, vector<1x3x512xf32>
    %1 = vector.shape_cast %0 : vector<1x3x512xf32> to vector<3x512xf32>
    %c0_2 = arith.constant 0 : index
    %c0_3 = arith.constant 0 : index
    %c0_4 = arith.constant 0 : index
    %2 = vector.load %arg3[%c0_2, %c0_3, %c0_4] : memref<1x32x3xf32, #tpu.memory_space<vmem>>, vector<1x32x3xf32>
    %3 = vector.shape_cast %2 : vector<1x32x3xf32> to vector<32x3xf32>
    %cst = arith.constant dense<0.000000e+00> : vector<32x512xf32>
    %4 = tpu.matmul %3, %1, %cst {dimension_numbers = #tpu.dot_dimension_numbers<[1], [0], [0], [1], [0, 0, 1, 1], [], []>} : vector<32x3xf32>, vector<3x512xf32>, vector<32x512xf32> -> vector<32x512xf32>
    %cst_5 = arith.constant 2.000000e-01 : f32
    %5 = vector.broadcast %cst_5 : f32 to vector<32x512xf32>
    %6 = arith.mulf %5, %4 : vector<32x512xf32>
    %7 = arith.maximumf %4, %6 : vector<32x512xf32>
    %c0_6 = arith.constant 0 : index
    %c0_7 = arith.constant 0 : index
    %c0_8 = arith.constant 0 : index
    %c0_9 = arith.constant 0 : index
    %8 = vector.load %arg4[%c0_6, %c0_7, %c0_8, %c0_9] : memref<1x9x32x32xf32, #tpu.memory_space<vmem>>, vector<1x1x32x32xf32>
    %9 = vector.shape_cast %8 : vector<1x1x32x32xf32> to vector<32x32xf32>
    %cst_10 = arith.constant dense<0.000000e+00> : vector<32x512xf32>
    %10 = tpu.matmul %9, %7, %cst_10 {dimension_numbers = #tpu.dot_dimension_numbers<[1], [0], [0], [1], [0, 0, 1, 1], [], []>} : vector<32x32xf32>, vector<32x512xf32>, vector<32x512xf32> -> vector<32x512xf32>
    %cst_11 = arith.constant 2.000000e-01 : f32
    %11 = vector.broadcast %cst_11 : f32 to vector<32x512xf32>
    %12 = arith.mulf %11, %10 : vector<32x512xf32>
    %13 = arith.maximumf %10, %12 : vector<32x512xf32>
    %c0_12 = arith.constant 0 : index
    %c1 = arith.constant 1 : index
    %c0_13 = arith.constant 0 : index
    %c0_14 = arith.constant 0 : index
    %14 = vector.load %arg4[%c0_12, %c1, %c0_13, %c0_14] : memref<1x9x32x32xf32, #tpu.memory_space<vmem>>, vector<1x1x32x32xf32>
    %15 = vector.shape_cast %14 : vector<1x1x32x32xf32> to vector<32x32xf32>
    %cst_15 = arith.constant dense<0.000000e+00> : vector<32x512xf32>
    %16 = tpu.matmul %15, %13, %cst_15 {dimension_numbers = #tpu.dot_dimension_numbers<[1], [0], [0], [1], [0, 0, 1, 1], [], []>} : vector<32x32xf32>, vector<32x512xf32>, vector<32x512xf32> -> vector<32x512xf32>
    %cst_16 = arith.constant 2.000000e-01 : f32
    %17 = vector.broadcast %cst_16 : f32 to vector<32x512xf32>
    %18 = arith.mulf %17, %16 : vector<32x512xf32>
    %19 = arith.maximumf %16, %18 : vector<32x512xf32>
    %c0_17 = arith.constant 0 : index
    %c2 = arith.constant 2 : index
    %c0_18 = arith.constant 0 : index
    %c0_19 = arith.constant 0 : index
    %20 = vector.load %arg4[%c0_17, %c2, %c0_18, %c0_19] : memref<1x9x32x32xf32, #tpu.memory_space<vmem>>, vector<1x1x32x32xf32>
    %21 = vector.shape_cast %20 : vector<1x1x32x32xf32> to vector<32x32xf32>
    %cst_20 = arith.constant dense<0.000000e+00> : vector<32x512xf32>
    %22 = tpu.matmul %21, %19, %cst_20 {dimension_numbers = #tpu.dot_dimension_numbers<[1], [0], [0], [1], [0, 0, 1, 1], [], []>} : vector<32x32xf32>, vector<32x512xf32>, vector<32x512xf32> -> vector<32x512xf32>
    %cst_21 = arith.constant 2.000000e-01 : f32
    %23 = vector.broadcast %cst_21 : f32 to vector<32x512xf32>
    %24 = arith.mulf %23, %22 : vector<32x512xf32>
    %25 = arith.maximumf %22, %24 : vector<32x512xf32>
    %c0_22 = arith.constant 0 : index
    %c3 = arith.constant 3 : index
    %c0_23 = arith.constant 0 : index
    %c0_24 = arith.constant 0 : index
    %26 = vector.load %arg4[%c0_22, %c3, %c0_23, %c0_24] : memref<1x9x32x32xf32, #tpu.memory_space<vmem>>, vector<1x1x32x32xf32>
    %27 = vector.shape_cast %26 : vector<1x1x32x32xf32> to vector<32x32xf32>
    %cst_25 = arith.constant dense<0.000000e+00> : vector<32x512xf32>
    %28 = tpu.matmul %27, %25, %cst_25 {dimension_numbers = #tpu.dot_dimension_numbers<[1], [0], [0], [1], [0, 0, 1, 1], [], []>} : vector<32x32xf32>, vector<32x512xf32>, vector<32x512xf32> -> vector<32x512xf32>
    %cst_26 = arith.constant 2.000000e-01 : f32
    %29 = vector.broadcast %cst_26 : f32 to vector<32x512xf32>
    %30 = arith.mulf %29, %28 : vector<32x512xf32>
    %31 = arith.maximumf %28, %30 : vector<32x512xf32>
    %c0_27 = arith.constant 0 : index
    %c4 = arith.constant 4 : index
    %c0_28 = arith.constant 0 : index
    %c0_29 = arith.constant 0 : index
    %32 = vector.load %arg4[%c0_27, %c4, %c0_28, %c0_29] : memref<1x9x32x32xf32, #tpu.memory_space<vmem>>, vector<1x1x32x32xf32>
    %33 = vector.shape_cast %32 : vector<1x1x32x32xf32> to vector<32x32xf32>
    %cst_30 = arith.constant dense<0.000000e+00> : vector<32x512xf32>
    %34 = tpu.matmul %33, %31, %cst_30 {dimension_numbers = #tpu.dot_dimension_numbers<[1], [0], [0], [1], [0, 0, 1, 1], [], []>} : vector<32x32xf32>, vector<32x512xf32>, vector<32x512xf32> -> vector<32x512xf32>
    %cst_31 = arith.constant 2.000000e-01 : f32
    %35 = vector.broadcast %cst_31 : f32 to vector<32x512xf32>
    %36 = arith.mulf %35, %34 : vector<32x512xf32>
    %37 = arith.maximumf %34, %36 : vector<32x512xf32>
    %c0_32 = arith.constant 0 : index
    %c5 = arith.constant 5 : index
    %c0_33 = arith.constant 0 : index
    %c0_34 = arith.constant 0 : index
    %38 = vector.load %arg4[%c0_32, %c5, %c0_33, %c0_34] : memref<1x9x32x32xf32, #tpu.memory_space<vmem>>, vector<1x1x32x32xf32>
    %39 = vector.shape_cast %38 : vector<1x1x32x32xf32> to vector<32x32xf32>
    %cst_35 = arith.constant dense<0.000000e+00> : vector<32x512xf32>
    %40 = tpu.matmul %39, %37, %cst_35 {dimension_numbers = #tpu.dot_dimension_numbers<[1], [0], [0], [1], [0, 0, 1, 1], [], []>} : vector<32x32xf32>, vector<32x512xf32>, vector<32x512xf32> -> vector<32x512xf32>
    %cst_36 = arith.constant 2.000000e-01 : f32
    %41 = vector.broadcast %cst_36 : f32 to vector<32x512xf32>
    %42 = arith.mulf %41, %40 : vector<32x512xf32>
    %43 = arith.maximumf %40, %42 : vector<32x512xf32>
    %c0_37 = arith.constant 0 : index
    %c6 = arith.constant 6 : index
    %c0_38 = arith.constant 0 : index
    %c0_39 = arith.constant 0 : index
    %44 = vector.load %arg4[%c0_37, %c6, %c0_38, %c0_39] : memref<1x9x32x32xf32, #tpu.memory_space<vmem>>, vector<1x1x32x32xf32>
    %45 = vector.shape_cast %44 : vector<1x1x32x32xf32> to vector<32x32xf32>
    %cst_40 = arith.constant dense<0.000000e+00> : vector<32x512xf32>
    %46 = tpu.matmul %45, %43, %cst_40 {dimension_numbers = #tpu.dot_dimension_numbers<[1], [0], [0], [1], [0, 0, 1, 1], [], []>} : vector<32x32xf32>, vector<32x512xf32>, vector<32x512xf32> -> vector<32x512xf32>
    %cst_41 = arith.constant 2.000000e-01 : f32
    %47 = vector.broadcast %cst_41 : f32 to vector<32x512xf32>
    %48 = arith.mulf %47, %46 : vector<32x512xf32>
    %49 = arith.maximumf %46, %48 : vector<32x512xf32>
    %c0_42 = arith.constant 0 : index
    %c0_43 = arith.constant 0 : index
    %c0_44 = arith.constant 0 : index
    %50 = vector.load %arg5[%c0_42, %c0_43, %c0_44] : memref<2x3x32xf32, #tpu.memory_space<vmem>>, vector<1x3x32xf32>
    %51 = vector.shape_cast %50 : vector<1x3x32xf32> to vector<3x32xf32>
    %cst_45 = arith.constant dense<0.000000e+00> : vector<3x512xf32>
    %52 = tpu.matmul %51, %49, %cst_45 {dimension_numbers = #tpu.dot_dimension_numbers<[1], [0], [0], [1], [0, 0, 1, 1], [], []>} : vector<3x32xf32>, vector<32x512xf32>, vector<3x512xf32> -> vector<3x512xf32>
    %c0_46 = arith.constant 0 : index
    %c7 = arith.constant 7 : index
    %c0_47 = arith.constant 0 : index
    %c0_48 = arith.constant 0 : index
    %53 = vector.load %arg4[%c0_46, %c7, %c0_47, %c0_48] : memref<1x9x32x32xf32, #tpu.memory_space<vmem>>, vector<1x1x32x32xf32>
    %54 = vector.shape_cast %53 : vector<1x1x32x32xf32> to vector<32x32xf32>
    %cst_49 = arith.constant dense<0.000000e+00> : vector<32x512xf32>
    %55 = tpu.matmul %54, %49, %cst_49 {dimension_numbers = #tpu.dot_dimension_numbers<[1], [0], [0], [1], [0, 0, 1, 1], [], []>} : vector<32x32xf32>, vector<32x512xf32>, vector<32x512xf32> -> vector<32x512xf32>
    %cst_50 = arith.constant 2.000000e-01 : f32
    %56 = vector.broadcast %cst_50 : f32 to vector<32x512xf32>
    %57 = arith.mulf %56, %55 : vector<32x512xf32>
    %58 = arith.maximumf %55, %57 : vector<32x512xf32>
    %c0_51 = arith.constant 0 : index
    %c8 = arith.constant 8 : index
    %c0_52 = arith.constant 0 : index
    %c0_53 = arith.constant 0 : index
    %59 = vector.load %arg4[%c0_51, %c8, %c0_52, %c0_53] : memref<1x9x32x32xf32, #tpu.memory_space<vmem>>, vector<1x1x32x32xf32>
    %60 = vector.shape_cast %59 : vector<1x1x32x32xf32> to vector<32x32xf32>
    %cst_54 = arith.constant dense<0.000000e+00> : vector<32x512xf32>
    %61 = tpu.matmul %60, %58, %cst_54 {dimension_numbers = #tpu.dot_dimension_numbers<[1], [0], [0], [1], [0, 0, 1, 1], [], []>} : vector<32x32xf32>, vector<32x512xf32>, vector<32x512xf32> -> vector<32x512xf32>
    %cst_55 = arith.constant 2.000000e-01 : f32
    %62 = vector.broadcast %cst_55 : f32 to vector<32x512xf32>
    %63 = arith.mulf %62, %61 : vector<32x512xf32>
    %64 = arith.maximumf %61, %63 : vector<32x512xf32>
    %65 = arith.addf %64, %49 : vector<32x512xf32>
    %c1_56 = arith.constant 1 : index
    %c0_57 = arith.constant 0 : index
    %c0_58 = arith.constant 0 : index
    %66 = vector.load %arg5[%c1_56, %c0_57, %c0_58] : memref<2x3x32xf32, #tpu.memory_space<vmem>>, vector<1x3x32xf32>
    %67 = vector.shape_cast %66 : vector<1x3x32xf32> to vector<3x32xf32>
    %cst_59 = arith.constant dense<0.000000e+00> : vector<3x512xf32>
    %68 = tpu.matmul %67, %65, %cst_59 {dimension_numbers = #tpu.dot_dimension_numbers<[1], [0], [0], [1], [0, 0, 1, 1], [], []>} : vector<3x32xf32>, vector<32x512xf32>, vector<3x512xf32> -> vector<3x512xf32>
    %69 = arith.addf %52, %68 : vector<3x512xf32>
    %c0_60 = arith.constant 0 : index
    %c0_61 = arith.constant 0 : index
    %70 = vector.load %arg6[%c0_60, %c0_61] : memref<3x1xf32, #tpu.memory_space<vmem>>, vector<3x1xf32>
    %71 = vector.broadcast %70 : vector<3x1xf32> to vector<3x512xf32>
    %72 = arith.addf %69, %71 : vector<3x512xf32>
    %73 = math.tanh %72 : vector<3x512xf32>
    %c0_62 = arith.constant 0 : index
    %c0_63 = arith.constant 0 : index
    %c0_64 = arith.constant 0 : index
    %74 = vector.load %arg7[%c0_62, %c0_63, %c0_64] : memref<1x3x512xf32, #tpu.memory_space<vmem>>, vector<1x3x512xf32>
    %75 = vector.shape_cast %74 : vector<1x3x512xf32> to vector<3x512xf32>
    %76 = vector.shape_cast %73 : vector<3x512xf32> to vector<1x3x512xf32>
    tpu.vector_store %arg7[%c0_62, %c0_63, %c0_64], %76 {strides = array<i32>} : memref<1x3x512xf32, #tpu.memory_space<vmem>>, vector<1x3x512xf32>,
    return
  }
  func.func @transform_0(%arg0: i32, %arg1: i32) -> (i32, i32, i32) {
    %c0_i32 = arith.constant 0 : i32
    %c0_i32_0 = arith.constant 0 : i32
    return %arg0, %c0_i32, %arg1 : i32, i32, i32
  }
  func.func @transform_1(%arg0: i32, %arg1: i32) -> (i32, i32, i32) {
    %c0_i32 = arith.constant 0 : i32
    %c0_i32_0 = arith.constant 0 : i32
    %c0_i32_1 = arith.constant 0 : i32
    return %arg0, %c0_i32, %c0_i32_0 : i32, i32, i32
  }
  func.func @transform_2(%arg0: i32, %arg1: i32) -> (i32, i32, i32, i32) {
    %c0_i32 = arith.constant 0 : i32
    %c0_i32_0 = arith.constant 0 : i32
    %c0_i32_1 = arith.constant 0 : i32
    %c0_i32_2 = arith.constant 0 : i32
    return %arg0, %c0_i32, %c0_i32_0, %c0_i32_1 : i32, i32, i32, i32
  }
  func.func @transform_3(%arg0: i32, %arg1: i32) -> (i32, i32, i32) {
    %c0_i32 = arith.constant 0 : i32
    %c0_i32_0 = arith.constant 0 : i32
    %c0_i32_1 = arith.constant 0 : i32
    %c0_i32_2 = arith.constant 0 : i32
    return %c0_i32, %c0_i32_0, %c0_i32_1 : i32, i32, i32
  }
  func.func @transform_4(%arg0: i32, %arg1: i32) -> (i32, i32) {
    %c0_i32 = arith.constant 0 : i32
    %c0_i32_0 = arith.constant 0 : i32
    %c0_i32_1 = arith.constant 0 : i32
    return %c0_i32, %c0_i32_0 : i32, i32
  }
  func.func @transform_5(%arg0: i32, %arg1: i32) -> (i32, i32, i32) {
    %c0_i32 = arith.constant 0 : i32
    %c0_i32_0 = arith.constant 0 : i32
    return %arg0, %c0_i32, %arg1 : i32, i32, i32
  }
}

</mosaic_0001>

<bundles_post_ra>
// kernel: tpu_custom_call.1
= control target key start
LH: loop header
LB: loop body
LE: loop exit
PB: predicated region body
PF: predicated region fallthrough
CT: control target
= control target key end

     0   :  { %10 = vsyncpa [#allocation3], 0  ;;  %s4070_s0 = inlined_call_operand.vmem [shape: f32[2,3,1024], index: 0, kind: input, shape index: {}]   ;;  %s4071_s1 = inlined_call_operand.vmem [shape: f32[2,32,3], index: 1, kind: input, shape index: {}]   ;;  %s4072_s2 = inlined_call_operand.hbm [shape: f32[2,9,32,32], index: 2, kind: input, shape index: {}]   ;;  %s4073_s3 = inlined_call_operand.vmem [shape: f32[2,3,32], index: 3, kind: input, shape index: {}]   ;;  %s4074_s4 = inlined_call_operand.vmem [shape: f32[3,1], index: 4, kind: input, shape index: {}]   ;;  %s4075_s5 = inlined_call_operand.vmem [shape: f32[2,3,1024], index: 5, kind: output, shape index: {}]  }
   0x1   :  { %12 = vsyncpa [#allocation3 + $0x1], 0  ;;  %s3607_s18 = smov 0   ;;  %s3609_s19 = smov 0  }
   0x2   :  { %s3611_s20 = smov 0   ;;  %s3613_s21 = smov 0  }
   0x3   :  { %s3615_s22 = smov 0   ;;  %s3617_s23 = smov 0  }
   0x4   :  { %s3619_s24 = smov 0   ;;  %s3621_s25 = smov 0  }
   0x5 LB: > { %s3067_s26 = sadd.s32 4294967295, %s3570_s25   ;;  %s27_s27 = sadd.s32 1, %s3562_s23  ;;  %s3570_s25 = sphi %s3621_s25, %s18_s25   ;;  %s3566_s24 = sphi %s3619_s24, %s4084_s24   ;;  %s3562_s23 = sphi %s3617_s23, %s4083_s23   ;;  %s3558_s22 = sphi %s3615_s22, %s4082_s22   ;;  %s3554_s21 = sphi %s3613_s21, %s4081_s21   ;;  %s3550_s20 = sphi %s3611_s20, %s4080_s20   ;;  %s3546_s19 = sphi %s3609_s19, %s4079_s19   ;;  %s3542_s18 = sphi %s3607_s18, %s4078_s18  }
   0x6   : > { %p28_p0 = scmp.ge.s32.totalorder %s27_s27, 2  ;;  %s30_s28 = sadd.s32 1, %s3566_s24 }
   0x7   : > { %s91_s29 = sadd.s32 1, %s3550_s20  ;;  %p98_p1 = scmp.ne.s32.totalorder %s3550_s20, %s3546_s19 }
   0x8   : > { %s4086_s27 = smov (%p28_p0, %s27_s27), 0  ;;  %s4088_s28 = smov (!%p28_p0, %s30_s28), %s3566_s24 }
   0x9   : > { %p99_p2 = scmp.eq.s32.totalorder %s3570_s25, 0  ;;  %p104_p3 = scmp.ne.s32.totalorder %s3546_s19, %s3542_s18 }
   0xa   : > { %p32_p4 = scmp.ge.s32.totalorder %s4088_s28, 2  ;;  %p105_p5 = scmp.eq.s32.totalorder %s3067_s26, 0 }
   0xb   : > { %p100_p6 = por %p99_p2, %p98_p1  ;;  %p3394_p8 = scmp.lt.s32.totalorder %s3570_s25, 4 }
   0xc   : > { %s4090_s28 = smov (%p32_p4, %s4088_s28), 0  ;;  %p3658_p7 = por %p105_p5, %p104_p3 }
   0xd   : > { %s88_s6 = ssub.s32 %s3566_s24, %s4090_s28  ;;  %s225_s7 = sand.u32 1, %s3550_s20  }
   0xe   : > { %p89_p9 = scmp.eq.s32.totalorder %s88_s6, 0  ;;  %s3385_s8 = smul.u32 288, %s225_s7 }
   0xf   : > { %p3666_p10 = pnand %p3394_p8, %p100_p6  ;;  %s3386_s11 = smul.u32 4608, %s3566_s24 }
  0x10   : > { %s3671_s10 = scalar_select %p89_p9, %s3550_s20, %s91_s29  }
  0x11   : > { %s229_s12 = scalar_lea.vmem [#allocation2], %s3385_s8  ;;  %s3677_s16 = scalar_lea.hbm %s4072_s2, %s3386_s11 }
  0x12   : > { %s236_s13 = sshll.u32 %s229_s12, 4  ;;  %s3681_s17 = scalar_lea.sflag [#allocation3], %s225_s7  ;;  %s3679_s13 = int_to_ptr.vmem [resolvable:$true] %s236_s13 }
  0x13   : > { %s3474_s18 = scalar_lea.hbm %s3677_s16, 4608  ;;  %p3476_p12 = pneg %p3666_p10 }
  0x14   : > { %p3475_p11 = scmp.ne.s32.totalorder %s3677_s16, %s3474_s18  ;;  %s3479_s6 = scalar_lea.hbm %s4072_s2, 9216 }
  0x15   : > { %p3480_p1 = scmp.lt.u32.totalorder %s3677_s16, %s4072_s2  ;;  %p3481_p2 = scmp.lt.u32.totalorder %s3479_s6, %s3474_s18 }
  0x16   : > { %p3477_p13 = pnand %p3476_p12, %p3475_p11  ;;  %p3483_p4 = scmp.lt.u32.totalorder %s3474_s18, %s3677_s16 }
  0x17   : > { %p3482_p3 = por %p3481_p2, %p3480_p1 }
  0x18   : > { %p3478_p0 = pneg %p3477_p13 }
  0x19   : > { %p3484_p5 = por %p3483_p4, %p3482_p3 }
  0x1b   : > { %p3485_p6 = pnand %p3484_p5, %p3478_p0 }
  0x1d   : > { %3488 = shalt.err (!%p3485_p6)
}
  0x1e   : > { %s3489_s7 = scalar_lea.vmem %s3679_s13, 4608  ;;  %s3572_s12 = smov [#allocation2]  }
  0x1f   : > { %p3490_p8 = scmp.ne.s32.totalorder %s3679_s13, %s3489_s7  ;;  %s3494_s14 = sshll.u32 %s3572_s12, 4  ;;  %s3495_s14 = int_to_ptr.vmem [resolvable:$false] %s3494_s14 }
  0x20   : > { %s3496_s15 = scalar_lea.vmem %s3495_s14, 9216  ;;  %p3497_p13 = scmp.lt.s32.totalorder %s3679_s13, %s3495_s14 }
  0x21   : > { %p3492_p9 = pnand %p3490_p8, %p3476_p12  ;;  %p3498_p1 = scmp.lt.s32.totalorder %s3496_s15, %s3489_s7 }
  0x23   : > { %p3493_p11 = pneg %p3492_p9  ;;  %p3499_p2 = por %p3498_p1, %p3497_p13 }
  0x25   : > { %p3500_p3 = pnand %p3499_p2, %p3493_p11 }
  0x27   : > { %3503 = shalt.err (!%p3500_p3)
}
  0x28   : > { %s3573_s18 = smov 128   ;;  %s3574_s26 = smov 8  }
  0x29   : > { %3393 = dma.hbm_to_vmem [thread:$0]  (!%p3666_p10), %s3677_s16, 4608, %s3679_s13, %s3681_s17, %s3573_s18, %s3573_s18, %s3574_s26  }
  0x2a   : > { %p3072_p12 = scmp.ge.s32.totalorder %s3570_s25, 1  ;;  %p244_p0 = scmp.lt.s32.totalorder %s3570_s25, 5 }
  0x2c   : > { %p245_p4 = pnand %p3072_p12, %p244_p0 }
  0x2d   : > { %s250_s29 = sand.u32 (!%p245_p4), 1, %s3546_s19  }
  0x2e   : > { %248 = sbr.rel (%p245_p4) target bundleno = 2657 (0xa61), region = 40  ;;  %s251_s8 = scalar_lea.sflag (!%p245_p4), [#allocation3], %s250_s29 }
  0x2f   : > { %s3387_s6 = smul.u32 (!%p245_p4), 288, %s250_s29 }
  0x31   : > { %s3712_s11 = scalar_lea.vmem (!%p245_p4), [#allocation2], %s3387_s6 }
  0x35   : > { %3537 = dma.done.wait (%p3658_p7), %s251_s8, 4608  }
  0x36   : > { %3539 = vsyncadd (%p3658_p7), %s251_s8, 4294962688  ;;  %s3073_s9 = sshll.u32 %s3554_s21, 2  ;;  %p300_p10 = scmp.lt.s32.totalorder %s3558_s22, 1  ;;  %v3575_v0 = vmov 0.0   ;;  %vm347_vm0 = vcmask 1042432   ;;  %vm334_vm1 = vcmask 23552  }
  0x37   : > { %p302_p5 = scmp.lt.s32.totalorder %s3073_s9, 7  ;;  %420 = vmatprep.mubr.f32.mxu0 %v3575_v0  ;;  %509 = vmatprep.mubr.f32.mxu1 %v3575_v0  ;;  %vm570_vm2 = vcmask 261120  }
  0x38   : > { %s4092_s22 = smov (!%p300_p10, %s3558_s22), 1 }
  0x39   : > { %s4094_s9 = smov (!%p302_p5, %s3073_s9), 7  ;;  %s3074_s13 = sshll.u32 %s4092_s22, 3 }
  0x3a   : > { %s3204_s16 = sshll.u32 %s4092_s22, 5  ;;  %s3723_s17 = sadd.s32 %s3074_s13, %s4094_s9 }
  0x3b   : > { %s3075_s30 = sshll.u32 %s3723_s17, 2  ;;  %s313_s18 = scalar_lea.vmem %s4071_s1, %s3204_s16 }
  0x3c   : > { %s307_s21 = scalar_lea.vmem %s4070_s0, %s3075_s30  ;;  %v326_v5 = vld [vmem:[%s313_s18] sm:$0xff]  ;;  %v327_v6 = vld [vmem:[%s313_s18 + $0x8] sm:$0xff]  ;;  %v328_v7 = vld [vmem:[%s313_s18 + $0x10] sm:$0xff]  ;;  %s322_s16 = scalar_lea.vmem %s4075_s5, %s3075_s30 }
  0x3d   : > { %v324_v1 = vld [vmem:[%s307_s21] sm:$0x77]  ;;  %v325_v2 = vld [vmem:[%s307_s21 + $0x8] sm:$0x77]  ;;  %v329_v8 = vld [vmem:[%s313_s18 + $0x18] sm:$0xff] }
  0x3e   : > { %v332_v3 = vcombine.high %v324_v1, %v324_v1  ;;  %v333_v4 = vcombine.high %v325_v2, %v325_v2 }
  0x40   : > { %3081 = vmatprep.subr.msk.mxu0 %vm347_vm0, %v332_v3  ;;  %3087 = vmatprep.subr.msk.mxu1 %vm347_vm0, %v333_v4  ;;  %v567_v3 = vld [vmem:[%s3712_s11 + $0x8] sm:$0xff]  ;;  %v568_v4 = vld [vmem:[%s3712_s11 + $0x10] sm:$0xff] }
  0x41   : > { %3082 = vmatpush1.msk.msra.mxu0 %vm347_vm0, %v324_v1  ;;  %3088 = vmatpush1.msk.msra.mxu1 %vm347_vm0, %v325_v2  ;;  %v566_v2 = vld [vmem:[%s3712_s11] sm:$0xff] }
  0x42   : > { %3083 = vmatmul.mubr.msk.f32.vlgmr.msra.gmra.mrb[0].mxu0 %vm334_vm1, %v326_v5  ;;  %3089 = vmatmul.mubr.msk.f32.vlgmr.msra.gmra.mrb[0].mxu1 %vm334_vm1, %v326_v5  ;;  %v569_v5 = vld [vmem:[%s3712_s11 + $0x18] sm:$0xff] }
  0x43   : > { %426 = vmatprep.mubr.f32.mxu0 %v3575_v0  ;;  %515 = vmatprep.mubr.f32.mxu1 %v3575_v0 }
  0x46   : > { %3084 = vmatmul.mubr.msk.f32.gmra.mrb[2].mxu0 %vm334_vm1, %v327_v6  ;;  %3090 = vmatmul.mubr.msk.f32.gmra.mrb[2].mxu1 %vm334_vm1, %v327_v6 }
  0x47   : > { %432 = vmatprep.mubr.f32.mxu0 %v3575_v0  ;;  %521 = vmatprep.mubr.f32.mxu1 %v3575_v0 }
  0x4a   : > { %3085 = vmatmul.mubr.msk.f32.gmra.mrb[4].mxu0 %vm334_vm1, %v328_v7  ;;  %3091 = vmatmul.mubr.msk.f32.gmra.mrb[4].mxu1 %vm334_vm1, %v328_v7 }
  0x4b   : > { %438 = vmatprep.mubr.f32.mxu0 %v3575_v0  ;;  %527 = vmatprep.mubr.f32.mxu1 %v3575_v0 }
  0x4e   : > { %3086 = vmatmul.mubr.msk.f32.gmra.mrb[6].mxu0 %vm334_vm1, %v329_v8  ;;  %3092 = vmatmul.mubr.msk.f32.gmra.mrb[6].mxu1 %vm334_vm1, %v329_v8 }
  0x4f   : > { %647 = vmatprep.mubr.f32.mxu0 %v3575_v0  ;;  %736 = vmatprep.mubr.f32.mxu1 %v3575_v0 }
 0x115   : > { %v422_v9 = vpop.f32.mrb[0].mxu0  ;;  %v511_v10 = vpop.f32.mrb[0].mxu1 }
 0x116   : > { %v424_v11 = vpop.f32.mrb[1].mxu0  ;;  %v513_v12 = vpop.f32.mrb[1].mxu1  ;;  %v534_v13 = vmul.f32 0.2, %v422_v9  ;;  %v536_v14 = vmul.f32 0.2, %v511_v10 }
 0x117   : > { %v535_v15 = vmul.f32 0.2, %v424_v11  ;;  %v537_v16 = vmul.f32 0.2, %v513_v12 }
 0x118   : > { %v550_v25 = vmax.f32 %v422_v9, %v534_v13  ;;  %v552_v26 = vmax.f32 %v511_v10, %v536_v14 }
 0x119   : > { %v428_v17 = vpop.f32.mrb[2].mxu0  ;;  %v517_v18 = vpop.f32.mrb[2].mxu1  ;;  %v551_v29 = vmax.f32 %v424_v11, %v535_v15  ;;  %v553_v30 = vmax.f32 %v513_v12, %v537_v16 }
 0x11a   : > { %v538_v19 = vmul.f32 0.2, %v428_v17  ;;  %v540_v20 = vmul.f32 0.2, %v517_v18  ;;  %v430_v21 = vpop.f32.mrb[3].mxu0  ;;  %v519_v22 = vpop.f32.mrb[3].mxu1 }
 0x11b   : > { %v539_v23 = vmul.f32 0.2, %v430_v21  ;;  %v541_v24 = vmul.f32 0.2, %v519_v22 }
 0x11c   : > { %v554_v27 = vmax.f32 %v428_v17, %v538_v19  ;;  %v556_v28 = vmax.f32 %v517_v18, %v540_v20 }
 0x11d   : > { %v555_v31 = vmax.f32 %v430_v21, %v539_v23  ;;  %v557_v32 = vmax.f32 %v519_v22, %v541_v24  ;;  %v434_v33 = vpop.f32.mrb[4].mxu0  ;;  %v523_v34 = vpop.f32.mrb[4].mxu1 }
 0x11e   : > { %v3207_v35 = vpack.c.bf16 %v554_v27, %v550_v25  ;;  %v3215_v36 = vpack.c.bf16 %v556_v28, %v552_v26  ;;  %v436_v37 = vpop.f32.mrb[5].mxu0  ;;  %v525_v38 = vpop.f32.mrb[5].mxu1  ;;  %v542_v41 = vmul.f32 0.2, %v434_v33  ;;  %v544_v42 = vmul.f32 0.2, %v523_v34 }
 0x11f   : > { %v3205_v39 = vpack.c.bf16 %v555_v31, %v551_v29  ;;  %v3213_v40 = vpack.c.bf16 %v557_v32, %v553_v30  ;;  %v543_v43 = vmul.f32 0.2, %v436_v37  ;;  %v545_v44 = vmul.f32 0.2, %v525_v38 }
 0x120   : > { %v558_v53 = vmax.f32 %v434_v33, %v542_v41  ;;  %v560_v54 = vmax.f32 %v523_v34, %v544_v42 }
 0x121   : > { %v440_v45 = vpop.f32.mrb[6].mxu0  ;;  %v529_v46 = vpop.f32.mrb[6].mxu1  ;;  %3206 = vmatprep.subr.bf16.mxu0 %v3205_v39  ;;  %3214 = vmatprep.subr.bf16.mxu1 %v3213_v40  ;;  %v559_v57 = vmax.f32 %v436_v37, %v543_v43  ;;  %v561_v58 = vmax.f32 %v525_v38, %v545_v44 }
 0x122   : > { %v546_v47 = vmul.f32 0.2, %v440_v45  ;;  %v548_v48 = vmul.f32 0.2, %v529_v46  ;;  %v442_v49 = vpop.f32.mrb[7].mxu0  ;;  %v531_v50 = vpop.f32.mrb[7].mxu1  ;;  %3208 = vmatpush1.bf16.msra.mxu0 %v3207_v35  ;;  %3216 = vmatpush1.bf16.msra.mxu1 %v3215_v36 }
 0x123   : > { %v547_v51 = vmul.f32 0.2, %v442_v49  ;;  %v549_v52 = vmul.f32 0.2, %v531_v50 }
 0x124   : > { %v562_v55 = vmax.f32 %v440_v45, %v546_v47  ;;  %v564_v56 = vmax.f32 %v529_v46, %v548_v48 }
 0x125   : > { %v563_v59 = vmax.f32 %v442_v49, %v547_v51  ;;  %v565_v60 = vmax.f32 %v531_v50, %v549_v52 }
 0x126   : > { %v3211_v61 = vpack.c.bf16 %v562_v55, %v558_v53  ;;  %v3219_v62 = vpack.c.bf16 %v564_v56, %v560_v54 }
 0x127   : > { %v3209_v63 = vpack.c.bf16 %v563_v59, %v559_v57  ;;  %v3217_v1 = vpack.c.bf16 %v565_v60, %v561_v58 }
 0x129   : > { %3210 = vmatprep.subr.bf16.mxu0 %v3209_v63  ;;  %3218 = vmatprep.subr.bf16.mxu1 %v3217_v1  ;;  %v3102_v63 = vld [vmem:[%s3712_s11 + $0x28] sm:$0xff]  ;;  %v3103_v1 = vld [vmem:[%s3712_s11 + $0x30] sm:$0xff] }
 0x12a   : > { %3212 = vmatpush1.bf16.msra.mxu0 %v3211_v61  ;;  %3220 = vmatpush1.bf16.msra.mxu1 %v3219_v62  ;;  %v3101_v62 = vld [vmem:[%s3712_s11 + $0x20] sm:$0xff] }
 0x12d   : > { %3093 = vmatmul.mubr.msk.f32.vlgmr.msra.gmra.mrb[8].mxu0 %vm570_vm2, %v566_v2  ;;  %3097 = vmatmul.mubr.msk.f32.vlgmr.msra.gmra.mrb[8].mxu1 %vm570_vm2, %v566_v2  ;;  %v3104_v2 = vld [vmem:[%s3712_s11 + $0x38] sm:$0xff] }
 0x12e   : > { %653 = vmatprep.mubr.f32.mxu0 %v3575_v0  ;;  %742 = vmatprep.mubr.f32.mxu1 %v3575_v0 }
 0x131   : > { %3094 = vmatmul.mubr.msk.f32.gmra.mrb[10].mxu0 %vm570_vm2, %v567_v3  ;;  %3098 = vmatmul.mubr.msk.f32.gmra.mrb[10].mxu1 %vm570_vm2, %v567_v3 }
 0x132   : > { %659 = vmatprep.mubr.f32.mxu0 %v3575_v0  ;;  %748 = vmatprep.mubr.f32.mxu1 %v3575_v0 }
 0x135   : > { %3095 = vmatmul.mubr.msk.f32.gmra.mrb[12].mxu0 %vm570_vm2, %v568_v4  ;;  %3099 = vmatmul.mubr.msk.f32.gmra.mrb[12].mxu1 %vm570_vm2, %v568_v4 }
 0x136   : > { %665 = vmatprep.mubr.f32.mxu0 %v3575_v0  ;;  %754 = vmatprep.mubr.f32.mxu1 %v3575_v0 }
 0x139   : > { %3096 = vmatmul.mubr.msk.f32.gmra.mrb[14].mxu0 %vm570_vm2, %v569_v5  ;;  %3100 = vmatmul.mubr.msk.f32.gmra.mrb[14].mxu1 %vm570_vm2, %v569_v5 }
 0x13a   : > { %874 = vmatprep.mubr.f32.mxu0 %v3575_v0  ;;  %963 = vmatprep.mubr.f32.mxu1 %v3575_v0 }
 0x200   : > { %v649_v6 = vpop.f32.mrb[8].mxu0  ;;  %v738_v7 = vpop.f32.mrb[8].mxu1 }
 0x201   : > { %v651_v8 = vpop.f32.mrb[9].mxu0  ;;  %v740_v9 = vpop.f32.mrb[9].mxu1  ;;  %v761_v10 = vmul.f32 0.2, %v649_v6  ;;  %v763_v11 = vmul.f32 0.2, %v738_v7 }
 0x202   : > { %v762_v12 = vmul.f32 0.2, %v651_v8  ;;  %v764_v13 = vmul.f32 0.2, %v740_v9 }
 0x203   : > { %v777_v22 = vmax.f32 %v649_v6, %v761_v10  ;;  %v779_v23 = vmax.f32 %v738_v7, %v763_v11 }
 0x204   : > { %v655_v14 = vpop.f32.mrb[10].mxu0  ;;  %v744_v15 = vpop.f32.mrb[10].mxu1  ;;  %v778_v26 = vmax.f32 %v651_v8, %v762_v12  ;;  %v780_v27 = vmax.f32 %v740_v9, %v764_v13 }
 0x205   : > { %v765_v16 = vmul.f32 0.2, %v655_v14  ;;  %v767_v17 = vmul.f32 0.2, %v744_v15  ;;  %v657_v18 = vpop.f32.mrb[11].mxu0  ;;  %v746_v19 = vpop.f32.mrb[11].mxu1 }
 0x206   : > { %v766_v20 = vmul.f32 0.2, %v657_v18  ;;  %v768_v21 = vmul.f32 0.2, %v746_v19 }
 0x207   : > { %v781_v24 = vmax.f32 %v655_v14, %v765_v16  ;;  %v783_v25 = vmax.f32 %v744_v15, %v767_v17 }
 0x208   : > { %v782_v28 = vmax.f32 %v657_v18, %v766_v20  ;;  %v784_v29 = vmax.f32 %v746_v19, %v768_v21  ;;  %v661_v30 = vpop.f32.mrb[12].mxu0  ;;  %v750_v31 = vpop.f32.mrb[12].mxu1 }
 0x209   : > { %v3223_v32 = vpack.c.bf16 %v781_v24, %v777_v22  ;;  %v3231_v33 = vpack.c.bf16 %v783_v25, %v779_v23  ;;  %v663_v34 = vpop.f32.mrb[13].mxu0  ;;  %v752_v35 = vpop.f32.mrb[13].mxu1  ;;  %v769_v38 = vmul.f32 0.2, %v661_v30  ;;  %v771_v39 = vmul.f32 0.2, %v750_v31 }
 0x20a   : > { %v3221_v36 = vpack.c.bf16 %v782_v28, %v778_v26  ;;  %v3229_v37 = vpack.c.bf16 %v784_v29, %v780_v27  ;;  %v770_v40 = vmul.f32 0.2, %v663_v34  ;;  %v772_v41 = vmul.f32 0.2, %v752_v35 }
 0x20b   : > { %v785_v50 = vmax.f32 %v661_v30, %v769_v38  ;;  %v787_v51 = vmax.f32 %v750_v31, %v771_v39 }
 0x20c   : > { %v667_v42 = vpop.f32.mrb[14].mxu0  ;;  %v756_v43 = vpop.f32.mrb[14].mxu1  ;;  %3222 = vmatprep.subr.bf16.mxu0 %v3221_v36  ;;  %3230 = vmatprep.subr.bf16.mxu1 %v3229_v37  ;;  %v786_v54 = vmax.f32 %v663_v34, %v770_v40  ;;  %v788_v55 = vmax.f32 %v752_v35, %v772_v41 }
 0x20d   : > { %v773_v44 = vmul.f32 0.2, %v667_v42  ;;  %v775_v45 = vmul.f32 0.2, %v756_v43  ;;  %v669_v46 = vpop.f32.mrb[15].mxu0  ;;  %v758_v47 = vpop.f32.mrb[15].mxu1  ;;  %3224 = vmatpush1.bf16.msra.mxu0 %v3223_v32  ;;  %3232 = vmatpush1.bf16.msra.mxu1 %v3231_v33 }
 0x20e   : > { %v774_v48 = vmul.f32 0.2, %v669_v46  ;;  %v776_v49 = vmul.f32 0.2, %v758_v47 }
 0x20f   : > { %v789_v52 = vmax.f32 %v667_v42, %v773_v44  ;;  %v791_v53 = vmax.f32 %v756_v43, %v775_v45 }
 0x210   : > { %v790_v56 = vmax.f32 %v669_v46, %v774_v48  ;;  %v792_v57 = vmax.f32 %v758_v47, %v776_v49 }
 0x211   : > { %v3227_v58 = vpack.c.bf16 %v789_v52, %v785_v50  ;;  %v3235_v59 = vpack.c.bf16 %v791_v53, %v787_v51 }
 0x212   : > { %v3225_v60 = vpack.c.bf16 %v790_v56, %v786_v54  ;;  %v3233_v61 = vpack.c.bf16 %v792_v57, %v788_v55 }
 0x214   : > { %3226 = vmatprep.subr.bf16.mxu0 %v3225_v60  ;;  %3234 = vmatprep.subr.bf16.mxu1 %v3233_v61  ;;  %v3114_v60 = vld [vmem:[%s3712_s11 + $0x48] sm:$0xff]  ;;  %v3115_v61 = vld [vmem:[%s3712_s11 + $0x50] sm:$0xff] }
 0x215   : > { %3228 = vmatpush1.bf16.msra.mxu0 %v3227_v58  ;;  %3236 = vmatpush1.bf16.msra.mxu1 %v3235_v59  ;;  %v3113_v59 = vld [vmem:[%s3712_s11 + $0x40] sm:$0xff] }
 0x218   : > { %3105 = vmatmul.mubr.msk.f32.vlgmr.msra.gmra.mrb[16].mxu0 %vm570_vm2, %v3101_v62  ;;  %3109 = vmatmul.mubr.msk.f32.vlgmr.msra.gmra.mrb[16].mxu1 %vm570_vm2, %v3101_v62  ;;  %v3116_v62 = vld [vmem:[%s3712_s11 + $0x58] sm:$0xff] }
 0x219   : > { %880 = vmatprep.mubr.f32.mxu0 %v3575_v0  ;;  %969 = vmatprep.mubr.f32.mxu1 %v3575_v0 }
 0x21c   : > { %3106 = vmatmul.mubr.msk.f32.gmra.mrb[18].mxu0 %vm570_vm2, %v3102_v63  ;;  %3110 = vmatmul.mubr.msk.f32.gmra.mrb[18].mxu1 %vm570_vm2, %v3102_v63 }
 0x21d   : > { %886 = vmatprep.mubr.f32.mxu0 %v3575_v0  ;;  %975 = vmatprep.mubr.f32.mxu1 %v3575_v0 }
 0x220   : > { %3107 = vmatmul.mubr.msk.f32.gmra.mrb[20].mxu0 %vm570_vm2, %v3103_v1  ;;  %3111 = vmatmul.mubr.msk.f32.gmra.mrb[20].mxu1 %vm570_vm2, %v3103_v1 }
 0x221   : > { %892 = vmatprep.mubr.f32.mxu0 %v3575_v0  ;;  %981 = vmatprep.mubr.f32.mxu1 %v3575_v0 }
 0x224   : > { %3108 = vmatmul.mubr.msk.f32.gmra.mrb[22].mxu0 %vm570_vm2, %v3104_v2  ;;  %3112 = vmatmul.mubr.msk.f32.gmra.mrb[22].mxu1 %vm570_vm2, %v3104_v2 }
 0x225   : > { %1101 = vmatprep.mubr.f32.mxu0 %v3575_v0  ;;  %1190 = vmatprep.mubr.f32.mxu1 %v3575_v0 }
 0x2eb   : > { %v876_v3 = vpop.f32.mrb[16].mxu0  ;;  %v965_v4 = vpop.f32.mrb[16].mxu1 }
 0x2ec   : > { %v878_v5 = vpop.f32.mrb[17].mxu0  ;;  %v967_v6 = vpop.f32.mrb[17].mxu1  ;;  %v988_v7 = vmul.f32 0.2, %v876_v3  ;;  %v990_v8 = vmul.f32 0.2, %v965_v4 }
 0x2ed   : > { %v989_v9 = vmul.f32 0.2, %v878_v5  ;;  %v991_v10 = vmul.f32 0.2, %v967_v6 }
 0x2ee   : > { %v1004_v19 = vmax.f32 %v876_v3, %v988_v7  ;;  %v1006_v20 = vmax.f32 %v965_v4, %v990_v8 }
 0x2ef   : > { %v882_v11 = vpop.f32.mrb[18].mxu0  ;;  %v971_v12 = vpop.f32.mrb[18].mxu1  ;;  %v1005_v23 = vmax.f32 %v878_v5, %v989_v9  ;;  %v1007_v24 = vmax.f32 %v967_v6, %v991_v10 }
 0x2f0   : > { %v992_v13 = vmul.f32 0.2, %v882_v11  ;;  %v994_v14 = vmul.f32 0.2, %v971_v12  ;;  %v884_v15 = vpop.f32.mrb[19].mxu0  ;;  %v973_v16 = vpop.f32.mrb[19].mxu1 }
 0x2f1   : > { %v993_v17 = vmul.f32 0.2, %v884_v15  ;;  %v995_v18 = vmul.f32 0.2, %v973_v16 }
 0x2f2   : > { %v1008_v21 = vmax.f32 %v882_v11, %v992_v13  ;;  %v1010_v22 = vmax.f32 %v971_v12, %v994_v14 }
 0x2f3   : > { %v1009_v25 = vmax.f32 %v884_v15, %v993_v17  ;;  %v1011_v26 = vmax.f32 %v973_v16, %v995_v18  ;;  %v888_v27 = vpop.f32.mrb[20].mxu0  ;;  %v977_v28 = vpop.f32.mrb[20].mxu1 }
 0x2f4   : > { %v3239_v29 = vpack.c.bf16 %v1008_v21, %v1004_v19  ;;  %v3247_v30 = vpack.c.bf16 %v1010_v22, %v1006_v20  ;;  %v890_v31 = vpop.f32.mrb[21].mxu0  ;;  %v979_v32 = vpop.f32.mrb[21].mxu1  ;;  %v996_v35 = vmul.f32 0.2, %v888_v27  ;;  %v998_v36 = vmul.f32 0.2, %v977_v28 }
 0x2f5   : > { %v3237_v33 = vpack.c.bf16 %v1009_v25, %v1005_v23  ;;  %v3245_v34 = vpack.c.bf16 %v1011_v26, %v1007_v24  ;;  %v997_v37 = vmul.f32 0.2, %v890_v31  ;;  %v999_v38 = vmul.f32 0.2, %v979_v32 }
 0x2f6   : > { %v1012_v47 = vmax.f32 %v888_v27, %v996_v35  ;;  %v1014_v48 = vmax.f32 %v977_v28, %v998_v36 }
 0x2f7   : > { %v894_v39 = vpop.f32.mrb[22].mxu0  ;;  %v983_v40 = vpop.f32.mrb[22].mxu1  ;;  %3238 = vmatprep.subr.bf16.mxu0 %v3237_v33  ;;  %3246 = vmatprep.subr.bf16.mxu1 %v3245_v34  ;;  %v1013_v51 = vmax.f32 %v890_v31, %v997_v37  ;;  %v1015_v52 = vmax.f32 %v979_v32, %v999_v38 }
 0x2f8   : > { %v1000_v41 = vmul.f32 0.2, %v894_v39  ;;  %v1002_v42 = vmul.f32 0.2, %v983_v40  ;;  %v896_v43 = vpop.f32.mrb[23].mxu0  ;;  %v985_v44 = vpop.f32.mrb[23].mxu1  ;;  %3240 = vmatpush1.bf16.msra.mxu0 %v3239_v29  ;;  %3248 = vmatpush1.bf16.msra.mxu1 %v3247_v30 }
 0x2f9   : > { %v1001_v45 = vmul.f32 0.2, %v896_v43  ;;  %v1003_v46 = vmul.f32 0.2, %v985_v44 }
 0x2fa   : > { %v1016_v49 = vmax.f32 %v894_v39, %v1000_v41  ;;  %v1018_v50 = vmax.f32 %v983_v40, %v1002_v42 }
 0x2fb   : > { %v1017_v53 = vmax.f32 %v896_v43, %v1001_v45  ;;  %v1019_v54 = vmax.f32 %v985_v44, %v1003_v46 }
 0x2fc   : > { %v3243_v55 = vpack.c.bf16 %v1016_v49, %v1012_v47  ;;  %v3251_v56 = vpack.c.bf16 %v1018_v50, %v1014_v48 }
 0x2fd   : > { %v3241_v57 = vpack.c.bf16 %v1017_v53, %v1013_v51  ;;  %v3249_v58 = vpack.c.bf16 %v1019_v54, %v1015_v52 }
 0x2ff   : > { %3242 = vmatprep.subr.bf16.mxu0 %v3241_v57  ;;  %3250 = vmatprep.subr.bf16.mxu1 %v3249_v58  ;;  %v3126_v57 = vld [vmem:[%s3712_s11 + $0x68] sm:$0xff]  ;;  %v3127_v58 = vld [vmem:[%s3712_s11 + $0x70] sm:$0xff] }
 0x300   : > { %3244 = vmatpush1.bf16.msra.mxu0 %v3243_v55  ;;  %3252 = vmatpush1.bf16.msra.mxu1 %v3251_v56  ;;  %v3125_v56 = vld [vmem:[%s3712_s11 + $0x60] sm:$0xff] }
 0x303   : > { %3117 = vmatmul.mubr.msk.f32.vlgmr.msra.gmra.mrb[24].mxu0 %vm570_vm2, %v3113_v59  ;;  %3121 = vmatmul.mubr.msk.f32.vlgmr.msra.gmra.mrb[24].mxu1 %vm570_vm2, %v3113_v59  ;;  %v3128_v59 = vld [vmem:[%s3712_s11 + $0x78] sm:$0xff] }
 0x304   : > { %1107 = vmatprep.mubr.f32.mxu0 %v3575_v0  ;;  %1196 = vmatprep.mubr.f32.mxu1 %v3575_v0 }
 0x307   : > { %3118 = vmatmul.mubr.msk.f32.gmra.mrb[26].mxu0 %vm570_vm2, %v3114_v60  ;;  %3122 = vmatmul.mubr.msk.f32.gmra.mrb[26].mxu1 %vm570_vm2, %v3114_v60 }
 0x308   : > { %1113 = vmatprep.mubr.f32.mxu0 %v3575_v0  ;;  %1202 = vmatprep.mubr.f32.mxu1 %v3575_v0 }
 0x30b   : > { %3119 = vmatmul.mubr.msk.f32.gmra.mrb[28].mxu0 %vm570_vm2, %v3115_v61  ;;  %3123 = vmatmul.mubr.msk.f32.gmra.mrb[28].mxu1 %vm570_vm2, %v3115_v61 }
 0x30c   : > { %1119 = vmatprep.mubr.f32.mxu0 %v3575_v0  ;;  %1208 = vmatprep.mubr.f32.mxu1 %v3575_v0 }
 0x30f   : > { %3120 = vmatmul.mubr.msk.f32.gmra.mrb[30].mxu0 %vm570_vm2, %v3116_v62  ;;  %3124 = vmatmul.mubr.msk.f32.gmra.mrb[30].mxu1 %vm570_vm2, %v3116_v62 }
 0x310   : > { %1328 = vmatprep.mubr.f32.mxu0 %v3575_v0  ;;  %1417 = vmatprep.mubr.f32.mxu1 %v3575_v0 }
 0x3d6   : > { %v1103_v63 = vpop.f32.mrb[24].mxu0  ;;  %v1192_v1 = vpop.f32.mrb[24].mxu1 }
 0x3d7   : > { %v1105_v2 = vpop.f32.mrb[25].mxu0  ;;  %v1194_v3 = vpop.f32.mrb[25].mxu1  ;;  %v1215_v4 = vmul.f32 0.2, %v1103_v63  ;;  %v1217_v5 = vmul.f32 0.2, %v1192_v1 }
 0x3d8   : > { %v1216_v6 = vmul.f32 0.2, %v1105_v2  ;;  %v1218_v7 = vmul.f32 0.2, %v1194_v3 }
 0x3d9   : > { %v1231_v16 = vmax.f32 %v1103_v63, %v1215_v4  ;;  %v1233_v17 = vmax.f32 %v1192_v1, %v1217_v5 }
 0x3da   : > { %v1109_v8 = vpop.f32.mrb[26].mxu0  ;;  %v1198_v9 = vpop.f32.mrb[26].mxu1  ;;  %v1232_v20 = vmax.f32 %v1105_v2, %v1216_v6  ;;  %v1234_v21 = vmax.f32 %v1194_v3, %v1218_v7 }
 0x3db   : > { %v1219_v10 = vmul.f32 0.2, %v1109_v8  ;;  %v1221_v11 = vmul.f32 0.2, %v1198_v9  ;;  %v1111_v12 = vpop.f32.mrb[27].mxu0  ;;  %v1200_v13 = vpop.f32.mrb[27].mxu1 }
 0x3dc   : > { %v1220_v14 = vmul.f32 0.2, %v1111_v12  ;;  %v1222_v15 = vmul.f32 0.2, %v1200_v13 }
 0x3dd   : > { %v1235_v18 = vmax.f32 %v1109_v8, %v1219_v10  ;;  %v1237_v19 = vmax.f32 %v1198_v9, %v1221_v11 }
 0x3de   : > { %v1236_v22 = vmax.f32 %v1111_v12, %v1220_v14  ;;  %v1238_v23 = vmax.f32 %v1200_v13, %v1222_v15  ;;  %v1115_v24 = vpop.f32.mrb[28].mxu0  ;;  %v1204_v25 = vpop.f32.mrb[28].mxu1 }
 0x3df   : > { %v3255_v26 = vpack.c.bf16 %v1235_v18, %v1231_v16  ;;  %v3263_v27 = vpack.c.bf16 %v1237_v19, %v1233_v17  ;;  %v1117_v28 = vpop.f32.mrb[29].mxu0  ;;  %v1206_v29 = vpop.f32.mrb[29].mxu1  ;;  %v1223_v32 = vmul.f32 0.2, %v1115_v24  ;;  %v1225_v33 = vmul.f32 0.2, %v1204_v25 }
 0x3e0   : > { %v3253_v30 = vpack.c.bf16 %v1236_v22, %v1232_v20  ;;  %v3261_v31 = vpack.c.bf16 %v1238_v23, %v1234_v21  ;;  %v1224_v34 = vmul.f32 0.2, %v1117_v28  ;;  %v1226_v35 = vmul.f32 0.2, %v1206_v29 }
 0x3e1   : > { %v1239_v44 = vmax.f32 %v1115_v24, %v1223_v32  ;;  %v1241_v45 = vmax.f32 %v1204_v25, %v1225_v33 }
 0x3e2   : > { %v1121_v36 = vpop.f32.mrb[30].mxu0  ;;  %v1210_v37 = vpop.f32.mrb[30].mxu1  ;;  %3254 = vmatprep.subr.bf16.mxu0 %v3253_v30  ;;  %3262 = vmatprep.subr.bf16.mxu1 %v3261_v31  ;;  %v1240_v48 = vmax.f32 %v1117_v28, %v1224_v34  ;;  %v1242_v49 = vmax.f32 %v1206_v29, %v1226_v35 }
 0x3e3   : > { %v1227_v38 = vmul.f32 0.2, %v1121_v36  ;;  %v1229_v39 = vmul.f32 0.2, %v1210_v37  ;;  %v1123_v40 = vpop.f32.mrb[31].mxu0  ;;  %v1212_v41 = vpop.f32.mrb[31].mxu1  ;;  %3256 = vmatpush1.bf16.msra.mxu0 %v3255_v26  ;;  %3264 = vmatpush1.bf16.msra.mxu1 %v3263_v27 }
 0x3e4   : > { %v1228_v42 = vmul.f32 0.2, %v1123_v40  ;;  %v1230_v43 = vmul.f32 0.2, %v1212_v41 }
 0x3e5   : > { %v1243_v46 = vmax.f32 %v1121_v36, %v1227_v38  ;;  %v1245_v47 = vmax.f32 %v1210_v37, %v1229_v39 }
 0x3e6   : > { %v1244_v50 = vmax.f32 %v1123_v40, %v1228_v42  ;;  %v1246_v51 = vmax.f32 %v1212_v41, %v1230_v43 }
 0x3e7   : > { %v3259_v52 = vpack.c.bf16 %v1243_v46, %v1239_v44  ;;  %v3267_v53 = vpack.c.bf16 %v1245_v47, %v1241_v45 }
 0x3e8   : > { %v3257_v54 = vpack.c.bf16 %v1244_v50, %v1240_v48  ;;  %v3265_v55 = vpack.c.bf16 %v1246_v51, %v1242_v49 }
 0x3ea   : > { %3258 = vmatprep.subr.bf16.mxu0 %v3257_v54  ;;  %3266 = vmatprep.subr.bf16.mxu1 %v3265_v55  ;;  %v3138_v54 = vld [vmem:[%s3712_s11 + $0x88] sm:$0xff]  ;;  %v3139_v55 = vld [vmem:[%s3712_s11 + $0x90] sm:$0xff] }
 0x3eb   : > { %3260 = vmatpush1.bf16.msra.mxu0 %v3259_v52  ;;  %3268 = vmatpush1.bf16.msra.mxu1 %v3267_v53  ;;  %v3137_v53 = vld [vmem:[%s3712_s11 + $0x80] sm:$0xff] }
 0x3ee   : > { %3129 = vmatmul.mubr.msk.f32.vlgmr.msra.gmra.mrb[32].mxu0 %vm570_vm2, %v3125_v56  ;;  %3133 = vmatmul.mubr.msk.f32.vlgmr.msra.gmra.mrb[32].mxu1 %vm570_vm2, %v3125_v56  ;;  %v3140_v56 = vld [vmem:[%s3712_s11 + $0x98] sm:$0xff] }
 0x3ef   : > { %1334 = vmatprep.mubr.f32.mxu0 %v3575_v0  ;;  %1423 = vmatprep.mubr.f32.mxu1 %v3575_v0 }
 0x3f2   : > { %3130 = vmatmul.mubr.msk.f32.gmra.mrb[34].mxu0 %vm570_vm2, %v3126_v57  ;;  %3134 = vmatmul.mubr.msk.f32.gmra.mrb[34].mxu1 %vm570_vm2, %v3126_v57 }
 0x3f3   : > { %1340 = vmatprep.mubr.f32.mxu0 %v3575_v0  ;;  %1429 = vmatprep.mubr.f32.mxu1 %v3575_v0 }
 0x3f6   : > { %3131 = vmatmul.mubr.msk.f32.gmra.mrb[36].mxu0 %vm570_vm2, %v3127_v58  ;;  %3135 = vmatmul.mubr.msk.f32.gmra.mrb[36].mxu1 %vm570_vm2, %v3127_v58 }
 0x3f7   : > { %1346 = vmatprep.mubr.f32.mxu0 %v3575_v0  ;;  %1435 = vmatprep.mubr.f32.mxu1 %v3575_v0 }
 0x3fa   : > { %3132 = vmatmul.mubr.msk.f32.gmra.mrb[38].mxu0 %vm570_vm2, %v3128_v59  ;;  %3136 = vmatmul.mubr.msk.f32.gmra.mrb[38].mxu1 %vm570_vm2, %v3128_v59 }
 0x3fb   : > { %1555 = vmatprep.mubr.f32.mxu0 %v3575_v0  ;;  %1644 = vmatprep.mubr.f32.mxu1 %v3575_v0 }
 0x4c1   : > { %v1330_v60 = vpop.f32.mrb[32].mxu0  ;;  %v1419_v61 = vpop.f32.mrb[32].mxu1 }
 0x4c2   : > { %v1332_v62 = vpop.f32.mrb[33].mxu0  ;;  %v1421_v63 = vpop.f32.mrb[33].mxu1  ;;  %v1442_v1 = vmul.f32 0.2, %v1330_v60  ;;  %v1444_v2 = vmul.f32 0.2, %v1419_v61 }
 0x4c3   : > { %v1443_v3 = vmul.f32 0.2, %v1332_v62  ;;  %v1445_v4 = vmul.f32 0.2, %v1421_v63 }
 0x4c4   : > { %v1458_v13 = vmax.f32 %v1330_v60, %v1442_v1  ;;  %v1460_v14 = vmax.f32 %v1419_v61, %v1444_v2 }
 0x4c5   : > { %v1336_v5 = vpop.f32.mrb[34].mxu0  ;;  %v1425_v6 = vpop.f32.mrb[34].mxu1  ;;  %v1459_v17 = vmax.f32 %v1332_v62, %v1443_v3  ;;  %v1461_v18 = vmax.f32 %v1421_v63, %v1445_v4 }
 0x4c6   : > { %v1446_v7 = vmul.f32 0.2, %v1336_v5  ;;  %v1448_v8 = vmul.f32 0.2, %v1425_v6  ;;  %v1338_v9 = vpop.f32.mrb[35].mxu0  ;;  %v1427_v10 = vpop.f32.mrb[35].mxu1 }
 0x4c7   : > { %v1447_v11 = vmul.f32 0.2, %v1338_v9  ;;  %v1449_v12 = vmul.f32 0.2, %v1427_v10 }
 0x4c8   : > { %v1462_v15 = vmax.f32 %v1336_v5, %v1446_v7  ;;  %v1464_v16 = vmax.f32 %v1425_v6, %v1448_v8 }
 0x4c9   : > { %v1463_v19 = vmax.f32 %v1338_v9, %v1447_v11  ;;  %v1465_v20 = vmax.f32 %v1427_v10, %v1449_v12  ;;  %v1342_v21 = vpop.f32.mrb[36].mxu0  ;;  %v1431_v22 = vpop.f32.mrb[36].mxu1 }
 0x4ca   : > { %v3271_v23 = vpack.c.bf16 %v1462_v15, %v1458_v13  ;;  %v3279_v24 = vpack.c.bf16 %v1464_v16, %v1460_v14  ;;  %v1344_v25 = vpop.f32.mrb[37].mxu0  ;;  %v1433_v26 = vpop.f32.mrb[37].mxu1  ;;  %v1450_v29 = vmul.f32 0.2, %v1342_v21  ;;  %v1452_v30 = vmul.f32 0.2, %v1431_v22 }
 0x4cb   : > { %v3269_v27 = vpack.c.bf16 %v1463_v19, %v1459_v17  ;;  %v3277_v28 = vpack.c.bf16 %v1465_v20, %v1461_v18  ;;  %v1451_v31 = vmul.f32 0.2, %v1344_v25  ;;  %v1453_v32 = vmul.f32 0.2, %v1433_v26 }
 0x4cc   : > { %v1466_v41 = vmax.f32 %v1342_v21, %v1450_v29  ;;  %v1468_v42 = vmax.f32 %v1431_v22, %v1452_v30 }
 0x4cd   : > { %v1348_v33 = vpop.f32.mrb[38].mxu0  ;;  %v1437_v34 = vpop.f32.mrb[38].mxu1  ;;  %3270 = vmatprep.subr.bf16.mxu0 %v3269_v27  ;;  %3278 = vmatprep.subr.bf16.mxu1 %v3277_v28  ;;  %v1467_v45 = vmax.f32 %v1344_v25, %v1451_v31  ;;  %v1469_v46 = vmax.f32 %v1433_v26, %v1453_v32 }
 0x4ce   : > { %v1454_v35 = vmul.f32 0.2, %v1348_v33  ;;  %v1456_v36 = vmul.f32 0.2, %v1437_v34  ;;  %v1350_v37 = vpop.f32.mrb[39].mxu0  ;;  %v1439_v38 = vpop.f32.mrb[39].mxu1  ;;  %3272 = vmatpush1.bf16.msra.mxu0 %v3271_v23  ;;  %3280 = vmatpush1.bf16.msra.mxu1 %v3279_v24 }
 0x4cf   : > { %v1455_v39 = vmul.f32 0.2, %v1350_v37  ;;  %v1457_v40 = vmul.f32 0.2, %v1439_v38 }
 0x4d0   : > { %v1470_v43 = vmax.f32 %v1348_v33, %v1454_v35  ;;  %v1472_v44 = vmax.f32 %v1437_v34, %v1456_v36 }
 0x4d1   : > { %v1471_v47 = vmax.f32 %v1350_v37, %v1455_v39  ;;  %v1473_v48 = vmax.f32 %v1439_v38, %v1457_v40 }
 0x4d2   : > { %v3275_v49 = vpack.c.bf16 %v1470_v43, %v1466_v41  ;;  %v3283_v50 = vpack.c.bf16 %v1472_v44, %v1468_v42 }
 0x4d3   : > { %v3273_v51 = vpack.c.bf16 %v1471_v47, %v1467_v45  ;;  %v3281_v52 = vpack.c.bf16 %v1473_v48, %v1469_v46 }
 0x4d5   : > { %3274 = vmatprep.subr.bf16.mxu0 %v3273_v51  ;;  %3282 = vmatprep.subr.bf16.mxu1 %v3281_v52  ;;  %v3150_v51 = vld [vmem:[%s3712_s11 + $0xa8] sm:$0xff]  ;;  %v3151_v52 = vld [vmem:[%s3712_s11 + $0xb0] sm:$0xff] }
 0x4d6   : > { %3276 = vmatpush1.bf16.msra.mxu0 %v3275_v49  ;;  %3284 = vmatpush1.bf16.msra.mxu1 %v3283_v50  ;;  %v3149_v50 = vld [vmem:[%s3712_s11 + $0xa0] sm:$0xff] }
 0x4d9   : > { %3141 = vmatmul.mubr.msk.f32.vlgmr.msra.gmra.mrb[40].mxu0 %vm570_vm2, %v3137_v53  ;;  %3145 = vmatmul.mubr.msk.f32.vlgmr.msra.gmra.mrb[40].mxu1 %vm570_vm2, %v3137_v53  ;;  %v3152_v53 = vld [vmem:[%s3712_s11 + $0xb8] sm:$0xff] }
 0x4da   : > { %1561 = vmatprep.mubr.f32.mxu0 %v3575_v0  ;;  %1650 = vmatprep.mubr.f32.mxu1 %v3575_v0 }
 0x4dd   : > { %3142 = vmatmul.mubr.msk.f32.gmra.mrb[42].mxu0 %vm570_vm2, %v3138_v54  ;;  %3146 = vmatmul.mubr.msk.f32.gmra.mrb[42].mxu1 %vm570_vm2, %v3138_v54 }
 0x4de   : > { %1567 = vmatprep.mubr.f32.mxu0 %v3575_v0  ;;  %1656 = vmatprep.mubr.f32.mxu1 %v3575_v0 }
 0x4e1   : > { %3143 = vmatmul.mubr.msk.f32.gmra.mrb[44].mxu0 %vm570_vm2, %v3139_v55  ;;  %3147 = vmatmul.mubr.msk.f32.gmra.mrb[44].mxu1 %vm570_vm2, %v3139_v55 }
 0x4e2   : > { %1573 = vmatprep.mubr.f32.mxu0 %v3575_v0  ;;  %1662 = vmatprep.mubr.f32.mxu1 %v3575_v0 }
 0x4e5   : > { %3144 = vmatmul.mubr.msk.f32.gmra.mrb[46].mxu0 %vm570_vm2, %v3140_v56  ;;  %3148 = vmatmul.mubr.msk.f32.gmra.mrb[46].mxu1 %vm570_vm2, %v3140_v56 }
 0x4e6   : > { %1782 = vmatprep.mubr.f32.mxu0 %v3575_v0  ;;  %1871 = vmatprep.mubr.f32.mxu1 %v3575_v0 }
 0x5ac   : > { %v1557_v57 = vpop.f32.mrb[40].mxu0  ;;  %v1646_v58 = vpop.f32.mrb[40].mxu1 }
 0x5ad   : > { %v1559_v59 = vpop.f32.mrb[41].mxu0  ;;  %v1648_v60 = vpop.f32.mrb[41].mxu1  ;;  %v1669_v61 = vmul.f32 0.2, %v1557_v57  ;;  %v1671_v62 = vmul.f32 0.2, %v1646_v58 }
 0x5ae   : > { %v1670_v63 = vmul.f32 0.2, %v1559_v59  ;;  %v1672_v1 = vmul.f32 0.2, %v1648_v60 }
 0x5af   : > { %v1685_v10 = vmax.f32 %v1557_v57, %v1669_v61  ;;  %v1687_v11 = vmax.f32 %v1646_v58, %v1671_v62 }
 0x5b0   : > { %v1563_v2 = vpop.f32.mrb[42].mxu0  ;;  %v1652_v3 = vpop.f32.mrb[42].mxu1  ;;  %v1686_v14 = vmax.f32 %v1559_v59, %v1670_v63  ;;  %v1688_v15 = vmax.f32 %v1648_v60, %v1672_v1 }
 0x5b1   : > { %v1673_v4 = vmul.f32 0.2, %v1563_v2  ;;  %v1675_v5 = vmul.f32 0.2, %v1652_v3  ;;  %v1565_v6 = vpop.f32.mrb[43].mxu0  ;;  %v1654_v7 = vpop.f32.mrb[43].mxu1 }
 0x5b2   : > { %v1674_v8 = vmul.f32 0.2, %v1565_v6  ;;  %v1676_v9 = vmul.f32 0.2, %v1654_v7 }
 0x5b3   : > { %v1689_v12 = vmax.f32 %v1563_v2, %v1673_v4  ;;  %v1691_v13 = vmax.f32 %v1652_v3, %v1675_v5 }
 0x5b4   : > { %v1690_v16 = vmax.f32 %v1565_v6, %v1674_v8  ;;  %v1692_v17 = vmax.f32 %v1654_v7, %v1676_v9  ;;  %v1569_v18 = vpop.f32.mrb[44].mxu0  ;;  %v1658_v19 = vpop.f32.mrb[44].mxu1 }
 0x5b5   : > { %v3287_v20 = vpack.c.bf16 %v1689_v12, %v1685_v10  ;;  %v3295_v21 = vpack.c.bf16 %v1691_v13, %v1687_v11  ;;  %v1571_v22 = vpop.f32.mrb[45].mxu0  ;;  %v1660_v23 = vpop.f32.mrb[45].mxu1  ;;  %v1677_v26 = vmul.f32 0.2, %v1569_v18  ;;  %v1679_v27 = vmul.f32 0.2, %v1658_v19 }
 0x5b6   : > { %v3285_v24 = vpack.c.bf16 %v1690_v16, %v1686_v14  ;;  %v3293_v25 = vpack.c.bf16 %v1692_v17, %v1688_v15  ;;  %v1678_v28 = vmul.f32 0.2, %v1571_v22  ;;  %v1680_v29 = vmul.f32 0.2, %v1660_v23 }
 0x5b7   : > { %v1693_v38 = vmax.f32 %v1569_v18, %v1677_v26  ;;  %v1695_v39 = vmax.f32 %v1658_v19, %v1679_v27 }
 0x5b8   : > { %v1575_v30 = vpop.f32.mrb[46].mxu0  ;;  %v1664_v31 = vpop.f32.mrb[46].mxu1  ;;  %3286 = vmatprep.subr.bf16.mxu0 %v3285_v24  ;;  %3294 = vmatprep.subr.bf16.mxu1 %v3293_v25  ;;  %v1694_v42 = vmax.f32 %v1571_v22, %v1678_v28  ;;  %v1696_v43 = vmax.f32 %v1660_v23, %v1680_v29 }
 0x5b9   : > { %v1681_v32 = vmul.f32 0.2, %v1575_v30  ;;  %v1683_v33 = vmul.f32 0.2, %v1664_v31  ;;  %v1577_v34 = vpop.f32.mrb[47].mxu0  ;;  %v1666_v35 = vpop.f32.mrb[47].mxu1  ;;  %3288 = vmatpush1.bf16.msra.mxu0 %v3287_v20  ;;  %3296 = vmatpush1.bf16.msra.mxu1 %v3295_v21 }
 0x5ba   : > { %v1682_v36 = vmul.f32 0.2, %v1577_v34  ;;  %v1684_v37 = vmul.f32 0.2, %v1666_v35 }
 0x5bb   : > { %v1697_v40 = vmax.f32 %v1575_v30, %v1681_v32  ;;  %v1699_v41 = vmax.f32 %v1664_v31, %v1683_v33 }
 0x5bc   : > { %v1698_v44 = vmax.f32 %v1577_v34, %v1682_v36  ;;  %v1700_v45 = vmax.f32 %v1666_v35, %v1684_v37 }
 0x5bd   : > { %v3291_v46 = vpack.c.bf16 %v1697_v40, %v1693_v38  ;;  %v3299_v47 = vpack.c.bf16 %v1699_v41, %v1695_v39 }
 0x5be   : > { %v3289_v48 = vpack.c.bf16 %v1698_v44, %v1694_v42  ;;  %v3297_v49 = vpack.c.bf16 %v1700_v45, %v1696_v43 }
 0x5c0   : > { %3290 = vmatprep.subr.bf16.mxu0 %v3289_v48  ;;  %3298 = vmatprep.subr.bf16.mxu1 %v3297_v49  ;;  %v3162_v48 = vld [vmem:[%s3712_s11 + $0xc8] sm:$0xff]  ;;  %v3163_v49 = vld [vmem:[%s3712_s11 + $0xd0] sm:$0xff] }
 0x5c1   : > { %3292 = vmatpush1.bf16.msra.mxu0 %v3291_v46  ;;  %3300 = vmatpush1.bf16.msra.mxu1 %v3299_v47  ;;  %v3161_v47 = vld [vmem:[%s3712_s11 + $0xc0] sm:$0xff] }
 0x5c4   : > { %3153 = vmatmul.mubr.msk.f32.vlgmr.msra.gmra.mrb[48].mxu0 %vm570_vm2, %v3149_v50  ;;  %3157 = vmatmul.mubr.msk.f32.vlgmr.msra.gmra.mrb[48].mxu1 %vm570_vm2, %v3149_v50  ;;  %v3164_v50 = vld [vmem:[%s3712_s11 + $0xd8] sm:$0xff] }
 0x5c5   : > { %1788 = vmatprep.mubr.f32.mxu0 %v3575_v0  ;;  %1877 = vmatprep.mubr.f32.mxu1 %v3575_v0 }
 0x5c8   : > { %3154 = vmatmul.mubr.msk.f32.gmra.mrb[50].mxu0 %vm570_vm2, %v3150_v51  ;;  %3158 = vmatmul.mubr.msk.f32.gmra.mrb[50].mxu1 %vm570_vm2, %v3150_v51 }
 0x5c9   : > { %1794 = vmatprep.mubr.f32.mxu0 %v3575_v0  ;;  %1883 = vmatprep.mubr.f32.mxu1 %v3575_v0 }
 0x5cc   : > { %3155 = vmatmul.mubr.msk.f32.gmra.mrb[52].mxu0 %vm570_vm2, %v3151_v52  ;;  %3159 = vmatmul.mubr.msk.f32.gmra.mrb[52].mxu1 %vm570_vm2, %v3151_v52 }
 0x5cd   : > { %1800 = vmatprep.mubr.f32.mxu0 %v3575_v0  ;;  %1889 = vmatprep.mubr.f32.mxu1 %v3575_v0 }
 0x5d0   : > { %3156 = vmatmul.mubr.msk.f32.gmra.mrb[54].mxu0 %vm570_vm2, %v3152_v53  ;;  %3160 = vmatmul.mubr.msk.f32.gmra.mrb[54].mxu1 %vm570_vm2, %v3152_v53 }
 0x5d1   : > { %2009 = vmatprep.mubr.f32.mxu0 %v3575_v0  ;;  %2098 = vmatprep.mubr.f32.mxu1 %v3575_v0 }
 0x697   : > { %v1784_v54 = vpop.f32.mrb[48].mxu0  ;;  %v1873_v55 = vpop.f32.mrb[48].mxu1 }
 0x698   : > { %v1786_v56 = vpop.f32.mrb[49].mxu0  ;;  %v1875_v57 = vpop.f32.mrb[49].mxu1  ;;  %v1896_v58 = vmul.f32 0.2, %v1784_v54  ;;  %v1898_v59 = vmul.f32 0.2, %v1873_v55 }
 0x699   : > { %v1897_v60 = vmul.f32 0.2, %v1786_v56  ;;  %v1899_v61 = vmul.f32 0.2, %v1875_v57 }
 0x69a   : > { %v1912_v7 = vmax.f32 %v1784_v54, %v1896_v58  ;;  %v1914_v8 = vmax.f32 %v1873_v55, %v1898_v59 }
 0x69b   : > { %v1790_v62 = vpop.f32.mrb[50].mxu0  ;;  %v1879_v63 = vpop.f32.mrb[50].mxu1  ;;  %v1913_v11 = vmax.f32 %v1786_v56, %v1897_v60  ;;  %v1915_v12 = vmax.f32 %v1875_v57, %v1899_v61 }
 0x69c   : > { %v1900_v1 = vmul.f32 0.2, %v1790_v62  ;;  %v1902_v2 = vmul.f32 0.2, %v1879_v63  ;;  %v1792_v3 = vpop.f32.mrb[51].mxu0  ;;  %v1881_v4 = vpop.f32.mrb[51].mxu1 }
 0x69d   : > { %v1901_v5 = vmul.f32 0.2, %v1792_v3  ;;  %v1903_v6 = vmul.f32 0.2, %v1881_v4 }
 0x69e   : > { %v1916_v9 = vmax.f32 %v1790_v62, %v1900_v1  ;;  %v1918_v10 = vmax.f32 %v1879_v63, %v1902_v2 }
 0x69f   : > { %v1917_v13 = vmax.f32 %v1792_v3, %v1901_v5  ;;  %v1919_v14 = vmax.f32 %v1881_v4, %v1903_v6  ;;  %v1796_v15 = vpop.f32.mrb[52].mxu0  ;;  %v1885_v16 = vpop.f32.mrb[52].mxu1 }
 0x6a0   : > { %v3303_v17 = vpack.c.bf16 %v1916_v9, %v1912_v7  ;;  %v3311_v18 = vpack.c.bf16 %v1918_v10, %v1914_v8  ;;  %v1798_v19 = vpop.f32.mrb[53].mxu0  ;;  %v1887_v20 = vpop.f32.mrb[53].mxu1  ;;  %v1904_v23 = vmul.f32 0.2, %v1796_v15  ;;  %v1906_v24 = vmul.f32 0.2, %v1885_v16 }
 0x6a1   : > { %v3301_v21 = vpack.c.bf16 %v1917_v13, %v1913_v11  ;;  %v3309_v22 = vpack.c.bf16 %v1919_v14, %v1915_v12  ;;  %v1905_v25 = vmul.f32 0.2, %v1798_v19  ;;  %v1907_v26 = vmul.f32 0.2, %v1887_v20 }
 0x6a2   : > { %v1920_v35 = vmax.f32 %v1796_v15, %v1904_v23  ;;  %v1922_v36 = vmax.f32 %v1885_v16, %v1906_v24 }
 0x6a3   : > { %v1802_v27 = vpop.f32.mrb[54].mxu0  ;;  %v1891_v28 = vpop.f32.mrb[54].mxu1  ;;  %3302 = vmatprep.subr.bf16.mxu0 %v3301_v21  ;;  %3310 = vmatprep.subr.bf16.mxu1 %v3309_v22  ;;  %v1921_v39 = vmax.f32 %v1798_v19, %v1905_v25  ;;  %v1923_v40 = vmax.f32 %v1887_v20, %v1907_v26 }
 0x6a4   : > { %v1908_v29 = vmul.f32 0.2, %v1802_v27  ;;  %v1910_v30 = vmul.f32 0.2, %v1891_v28  ;;  %v1804_v31 = vpop.f32.mrb[55].mxu0  ;;  %v1893_v32 = vpop.f32.mrb[55].mxu1  ;;  %3304 = vmatpush1.bf16.msra.mxu0 %v3303_v17  ;;  %3312 = vmatpush1.bf16.msra.mxu1 %v3311_v18 }
 0x6a5   : > { %v1909_v33 = vmul.f32 0.2, %v1804_v31  ;;  %v1911_v34 = vmul.f32 0.2, %v1893_v32 }
 0x6a6   : > { %v1924_v37 = vmax.f32 %v1802_v27, %v1908_v29  ;;  %v1926_v38 = vmax.f32 %v1891_v28, %v1910_v30 }
 0x6a7   : > { %v1925_v41 = vmax.f32 %v1804_v31, %v1909_v33  ;;  %v1927_v42 = vmax.f32 %v1893_v32, %v1911_v34 }
 0x6a8   : > { %v3307_v43 = vpack.c.bf16 %v1924_v37, %v1920_v35  ;;  %v3315_v44 = vpack.c.bf16 %v1926_v38, %v1922_v36 }
 0x6a9   : > { %v3305_v45 = vpack.c.bf16 %v1925_v41, %v1921_v39  ;;  %v3313_v46 = vpack.c.bf16 %v1927_v42, %v1923_v40 }
 0x6ab   : > { %3306 = vmatprep.subr.bf16.mxu0 %v3305_v45  ;;  %3314 = vmatprep.subr.bf16.mxu1 %v3313_v46  ;;  %v3174_v45 = vld [vmem:[%s3712_s11 + $0xe8] sm:$0xff]  ;;  %v3175_v46 = vld [vmem:[%s3712_s11 + $0xf0] sm:$0xff] }
 0x6ac   : > { %3308 = vmatpush1.bf16.msra.mxu0 %v3307_v43  ;;  %3316 = vmatpush1.bf16.msra.mxu1 %v3315_v44  ;;  %v3173_v44 = vld [vmem:[%s3712_s11 + $0xe0] sm:$0xff] }
 0x6af   : > { %3165 = vmatmul.mubr.msk.f32.vlgmr.msra.gmra.mrb[56].mxu0 %vm570_vm2, %v3161_v47  ;;  %3169 = vmatmul.mubr.msk.f32.vlgmr.msra.gmra.mrb[56].mxu1 %vm570_vm2, %v3161_v47  ;;  %v3176_v47 = vld [vmem:[%s3712_s11 + $0xf8] sm:$0xff] }
 0x6b0   : > { %2015 = vmatprep.mubr.f32.mxu0 %v3575_v0  ;;  %2104 = vmatprep.mubr.f32.mxu1 %v3575_v0 }
 0x6b3   : > { %3166 = vmatmul.mubr.msk.f32.gmra.mrb[58].mxu0 %vm570_vm2, %v3162_v48  ;;  %3170 = vmatmul.mubr.msk.f32.gmra.mrb[58].mxu1 %vm570_vm2, %v3162_v48 }
 0x6b4   : > { %2021 = vmatprep.mubr.f32.mxu0 %v3575_v0  ;;  %2110 = vmatprep.mubr.f32.mxu1 %v3575_v0 }
 0x6b7   : > { %3167 = vmatmul.mubr.msk.f32.gmra.mrb[60].mxu0 %vm570_vm2, %v3163_v49  ;;  %3171 = vmatmul.mubr.msk.f32.gmra.mrb[60].mxu1 %vm570_vm2, %v3163_v49 }
 0x6b8   : > { %2027 = vmatprep.mubr.f32.mxu0 %v3575_v0  ;;  %2116 = vmatprep.mubr.f32.mxu1 %v3575_v0 }
 0x6bb   : > { %3168 = vmatmul.mubr.msk.f32.gmra.mrb[62].mxu0 %vm570_vm2, %v3164_v50  ;;  %3172 = vmatmul.mubr.msk.f32.gmra.mrb[62].mxu1 %vm570_vm2, %v3164_v50 }
 0x6bc   : > { %2237 = vmatprep.mubr.f32.mxu0 %v3575_v0  ;;  %2326 = vmatprep.mubr.f32.mxu1 %v3575_v0 }
 0x782   : > { %v2011_v51 = vpop.f32.mrb[56].mxu0  ;;  %v2100_v52 = vpop.f32.mrb[56].mxu1 }
 0x783   : > { %v2013_v53 = vpop.f32.mrb[57].mxu0  ;;  %v2102_v54 = vpop.f32.mrb[57].mxu1  ;;  %v2123_v55 = vmul.f32 0.2, %v2011_v51  ;;  %v2125_v56 = vmul.f32 0.2, %v2100_v52 }
 0x784   : > { %v2124_v57 = vmul.f32 0.2, %v2013_v53  ;;  %v2126_v58 = vmul.f32 0.2, %v2102_v54 }
 0x785   : > { %v3902_v12 = vmax.f32 %v2011_v51, %v2123_v55  ;;  %v3904_v13 = vmax.f32 %v2100_v52, %v2125_v56 }
 0x786   : > { %v2017_v59 = vpop.f32.mrb[58].mxu0  ;;  %v2106_v60 = vpop.f32.mrb[58].mxu1  ;;  %v3894_v6 = vmax.f32 %v2013_v53, %v2124_v57  ;;  %v3896_v7 = vmax.f32 %v2102_v54, %v2126_v58 }
 0x787   : > { %v2127_v61 = vmul.f32 0.2, %v2017_v59  ;;  %v2129_v62 = vmul.f32 0.2, %v2106_v60  ;;  %v2019_v63 = vpop.f32.mrb[59].mxu0  ;;  %v2108_v1 = vpop.f32.mrb[59].mxu1 }
 0x788   : > { %v2128_v2 = vmul.f32 0.2, %v2019_v63  ;;  %v2130_v3 = vmul.f32 0.2, %v2108_v1 }
 0x789   : > { %v3890_v4 = vmax.f32 %v2017_v59, %v2127_v61  ;;  %v3892_v5 = vmax.f32 %v2106_v60, %v2129_v62 }
 0x78a   : > { %v3898_v8 = vmax.f32 %v2019_v63, %v2128_v2  ;;  %v3900_v9 = vmax.f32 %v2108_v1, %v2130_v3  ;;  %v2023_v10 = vpop.f32.mrb[60].mxu0  ;;  %v2112_v11 = vpop.f32.mrb[60].mxu1 }
 0x78b   : > { %v2025_v14 = vpop.f32.mrb[61].mxu0  ;;  %v2114_v15 = vpop.f32.mrb[61].mxu1  ;;  %v3916_v18 = vpack.c.bf16 %v3890_v4, %v3902_v12  ;;  %v3920_v19 = vpack.c.bf16 %v3892_v5, %v3904_v13  ;;  %v2131_v20 = vmul.f32 0.2, %v2023_v10  ;;  %v2133_v21 = vmul.f32 0.2, %v2112_v11 }
 0x78c   : > { %v3908_v16 = vpack.c.bf16 %v3898_v8, %v3894_v6  ;;  %v3912_v17 = vpack.c.bf16 %v3900_v9, %v3896_v7  ;;  %v2132_v22 = vmul.f32 0.2, %v2025_v14  ;;  %v2134_v23 = vmul.f32 0.2, %v2114_v15 }
 0x78d   : > { %v3938_v38 = vmax.f32 %v2023_v10, %v2131_v20  ;;  %v3940_v39 = vmax.f32 %v2112_v11, %v2133_v21 }
 0x78e   : > { %v2029_v24 = vpop.f32.mrb[62].mxu0  ;;  %v2118_v25 = vpop.f32.mrb[62].mxu1  ;;  %3318 = vmatprep.subr.bf16.mxu0 %v3908_v16  ;;  %3326 = vmatprep.subr.bf16.mxu1 %v3912_v17  ;;  %v3930_v34 = vmax.f32 %v2025_v14, %v2132_v22  ;;  %v3932_v35 = vmax.f32 %v2114_v15, %v2134_v23 }
 0x78f   : > { %v2135_v26 = vmul.f32 0.2, %v2029_v24  ;;  %v2137_v27 = vmul.f32 0.2, %v2118_v25  ;;  %v2031_v28 = vpop.f32.mrb[63].mxu0  ;;  %v2120_v29 = vpop.f32.mrb[63].mxu1  ;;  %3320 = vmatpush1.bf16.msra.mxu0 %v3916_v18  ;;  %3328 = vmatpush1.bf16.msra.mxu1 %v3920_v19 }
 0x790   : > { %v2136_v30 = vmul.f32 0.2, %v2031_v28  ;;  %v2138_v31 = vmul.f32 0.2, %v2120_v29 }
 0x791   : > { %v3926_v32 = vmax.f32 %v2029_v24, %v2135_v26  ;;  %v3928_v33 = vmax.f32 %v2118_v25, %v2137_v27 }
 0x792   : > { %v3934_v36 = vmax.f32 %v2031_v28, %v2136_v30  ;;  %v3936_v37 = vmax.f32 %v2120_v29, %v2138_v31 }
 0x793   : > { %v3952_v42 = vpack.c.bf16 %v3926_v32, %v3938_v38  ;;  %v3956_v43 = vpack.c.bf16 %v3928_v33, %v3940_v39 }
 0x794   : > { %v3944_v40 = vpack.c.bf16 %v3934_v36, %v3930_v34  ;;  %v3948_v41 = vpack.c.bf16 %v3936_v37, %v3932_v35 }
 0x796   : > { %3322 = vmatprep.subr.bf16.mxu0 %v3944_v40  ;;  %3330 = vmatprep.subr.bf16.mxu1 %v3948_v41 }
 0x797   : > { %3324 = vmatpush1.bf16.msra.mxu0 %v3952_v42  ;;  %3332 = vmatpush1.bf16.msra.mxu1 %v3956_v43 }
 0x79a   : > { %3177 = vmatmul.mubr.msk.f32.vlgmr.msra.gmra.mrb[64].mxu0 %vm570_vm2, %v3173_v44  ;;  %3181 = vmatmul.mubr.msk.f32.vlgmr.msra.gmra.mrb[64].mxu1 %vm570_vm2, %v3173_v44 }
 0x79b   : > { %2243 = vmatprep.mubr.f32.mxu0 %v3575_v0  ;;  %2332 = vmatprep.mubr.f32.mxu1 %v3575_v0 }
 0x79e   : > { %3178 = vmatmul.mubr.msk.f32.gmra.mrb[66].mxu0 %vm570_vm2, %v3174_v45  ;;  %3182 = vmatmul.mubr.msk.f32.gmra.mrb[66].mxu1 %vm570_vm2, %v3174_v45 }
 0x79f   : > { %2249 = vmatprep.mubr.f32.mxu0 %v3575_v0  ;;  %2338 = vmatprep.mubr.f32.mxu1 %v3575_v0 }
 0x7a2   : > { %3179 = vmatmul.mubr.msk.f32.gmra.mrb[68].mxu0 %vm570_vm2, %v3175_v46  ;;  %3183 = vmatmul.mubr.msk.f32.gmra.mrb[68].mxu1 %vm570_vm2, %v3175_v46 }
 0x7a3   : > { %2255 = vmatprep.mubr.f32.mxu0 %v3575_v0  ;;  %2344 = vmatprep.mubr.f32.mxu1 %v3575_v0 }
 0x7a6   : > { %3180 = vmatmul.mubr.msk.f32.gmra.mrb[70].mxu0 %vm570_vm2, %v3176_v47  ;;  %3184 = vmatmul.mubr.msk.f32.gmra.mrb[70].mxu1 %vm570_vm2, %v3176_v47 }
 0x7a7   : > { %2464 = vmatprep.mubr.f32.mxu0 %v3575_v0  ;;  %2553 = vmatprep.mubr.f32.mxu1 %v3575_v0 }
 0x86d   : > { %v2239_v48 = vpop.f32.mrb[64].mxu0  ;;  %v2328_v49 = vpop.f32.mrb[64].mxu1 }
 0x86e   : > { %v2241_v50 = vpop.f32.mrb[65].mxu0  ;;  %v2330_v51 = vpop.f32.mrb[65].mxu1  ;;  %v2351_v52 = vmul.f32 0.2, %v2239_v48  ;;  %v2353_v53 = vmul.f32 0.2, %v2328_v49 }
 0x86f   : > { %v2352_v54 = vmul.f32 0.2, %v2241_v50  ;;  %v2354_v55 = vmul.f32 0.2, %v2330_v51 }
 0x870   : > { %v2367_v1 = vmax.f32 %v2239_v48, %v2351_v52  ;;  %v2369_v2 = vmax.f32 %v2328_v49, %v2353_v53 }
 0x871   : > { %v2245_v56 = vpop.f32.mrb[66].mxu0  ;;  %v2334_v57 = vpop.f32.mrb[66].mxu1  ;;  %v2368_v11 = vmax.f32 %v2241_v50, %v2352_v54  ;;  %v2370_v14 = vmax.f32 %v2330_v51, %v2354_v55 }
 0x872   : > { %v2355_v58 = vmul.f32 0.2, %v2245_v56  ;;  %v2357_v59 = vmul.f32 0.2, %v2334_v57  ;;  %v2247_v60 = vpop.f32.mrb[67].mxu0  ;;  %v2336_v61 = vpop.f32.mrb[67].mxu1 }
 0x873   : > { %v2356_v62 = vmul.f32 0.2, %v2247_v60  ;;  %v2358_v63 = vmul.f32 0.2, %v2336_v61 }
 0x874   : > { %v2371_v3 = vmax.f32 %v2245_v56, %v2355_v58  ;;  %v2373_v10 = vmax.f32 %v2334_v57, %v2357_v59 }
 0x875   : > { %v2372_v15 = vmax.f32 %v2247_v60, %v2356_v62  ;;  %v2374_v20 = vmax.f32 %v2336_v61, %v2358_v63  ;;  %v2251_v21 = vpop.f32.mrb[68].mxu0  ;;  %v2340_v22 = vpop.f32.mrb[68].mxu1 }
 0x876   : > { %v3335_v23 = vpack.c.bf16 %v2371_v3, %v2367_v1  ;;  %v3343_v24 = vpack.c.bf16 %v2373_v10, %v2369_v2  ;;  %v2253_v25 = vpop.f32.mrb[69].mxu0  ;;  %v2342_v26 = vpop.f32.mrb[69].mxu1  ;;  %v2359_v29 = vmul.f32 0.2, %v2251_v21  ;;  %v2361_v30 = vmul.f32 0.2, %v2340_v22 }
 0x877   : > { %v3333_v27 = vpack.c.bf16 %v2372_v15, %v2368_v11  ;;  %v3341_v28 = vpack.c.bf16 %v2374_v20, %v2370_v14  ;;  %v2360_v31 = vmul.f32 0.2, %v2253_v25  ;;  %v2362_v44 = vmul.f32 0.2, %v2342_v26  ;;  %v3185_v2 = vld [vmem:[%s3712_s11 + $0x100] sm:$0xff]  ;;  %v3186_v3 = vld [vmem:[%s3712_s11 + $0x108] sm:$0xff] }
 0x878   : > { %v2375_v53 = vmax.f32 %v2251_v21, %v2359_v29  ;;  %v2377_v54 = vmax.f32 %v2340_v22, %v2361_v30  ;;  %v3187_v10 = vld [vmem:[%s3712_s11 + $0x110] sm:$0xff]  ;;  %v3188_v11 = vld [vmem:[%s3712_s11 + $0x118] sm:$0xff]  ;;  %v2918_v14 = vld [vmem:[%s4074_s4] sm:$0x7]  ;;  %v3576_v15 = vmov 0  }
 0x879   : > { %v2257_v45 = vpop.f32.mrb[70].mxu0  ;;  %v2346_v46 = vpop.f32.mrb[70].mxu1  ;;  %3334 = vmatprep.subr.bf16.mxu0 %v3333_v27  ;;  %3342 = vmatprep.subr.bf16.mxu1 %v3341_v28  ;;  %v2376_v57 = vmax.f32 %v2253_v25, %v2360_v31  ;;  %v2378_v58 = vmax.f32 %v2342_v26, %v2362_v44 }
 0x87a   : > { %v2363_v47 = vmul.f32 0.2, %v2257_v45  ;;  %v2365_v48 = vmul.f32 0.2, %v2346_v46  ;;  %v2259_v49 = vpop.f32.mrb[71].mxu0  ;;  %v2348_v50 = vpop.f32.mrb[71].mxu1  ;;  %3336 = vmatpush1.bf16.msra.mxu0 %v3335_v23  ;;  %3344 = vmatpush1.bf16.msra.mxu1 %v3343_v24 }
 0x87b   : > { %v2364_v51 = vmul.f32 0.2, %v2259_v49  ;;  %v2366_v52 = vmul.f32 0.2, %v2348_v50  ;;  %3463 = vset.pattern.permute.xlu0 %v3576_v15 }
 0x87c   : > { %v2379_v55 = vmax.f32 %v2257_v45, %v2363_v47  ;;  %v2381_v56 = vmax.f32 %v2346_v46, %v2365_v48  ;;  %2921 = vperm.xlu0 %3463, %v2918_v14  }
 0x87d   : > { %v2380_v59 = vmax.f32 %v2259_v49, %v2364_v51  ;;  %v2382_v60 = vmax.f32 %v2348_v50, %v2366_v52 }
 0x87e   : > { %v3339_v61 = vpack.c.bf16 %v2379_v55, %v2375_v53  ;;  %v3347_v62 = vpack.c.bf16 %v2381_v56, %v2377_v54 }
 0x87f   : > { %v3337_v63 = vpack.c.bf16 %v2380_v59, %v2376_v57  ;;  %v3345_v1 = vpack.c.bf16 %v2382_v60, %v2378_v58 }
 0x881   : > { %3338 = vmatprep.subr.bf16.mxu0 %v3337_v63  ;;  %3346 = vmatprep.subr.bf16.mxu1 %v3345_v1 }
 0x882   : > { %3340 = vmatpush1.bf16.msra.mxu0 %v3339_v61  ;;  %3348 = vmatpush1.bf16.msra.mxu1 %v3347_v62 }
 0x885   : > { %3189 = vmatmul.mubr.msk.f32.vlgmr.msra.gmra.mrb[72].mxu0 %vm570_vm2, %v3185_v2  ;;  %3193 = vmatmul.mubr.msk.f32.vlgmr.msra.gmra.mrb[72].mxu1 %vm570_vm2, %v3185_v2 }
 0x886   : > { %2470 = vmatprep.mubr.f32.mxu0 %v3575_v0  ;;  %2559 = vmatprep.mubr.f32.mxu1 %v3575_v0 }
 0x889   : > { %3190 = vmatmul.mubr.msk.f32.gmra.mrb[74].mxu0 %vm570_vm2, %v3186_v3  ;;  %3194 = vmatmul.mubr.msk.f32.gmra.mrb[74].mxu1 %vm570_vm2, %v3186_v3 }
 0x88a   : > { %2476 = vmatprep.mubr.f32.mxu0 %v3575_v0  ;;  %2565 = vmatprep.mubr.f32.mxu1 %v3575_v0 }
 0x88d   : > { %3191 = vmatmul.mubr.msk.f32.gmra.mrb[76].mxu0 %vm570_vm2, %v3187_v10  ;;  %3195 = vmatmul.mubr.msk.f32.gmra.mrb[76].mxu1 %vm570_vm2, %v3187_v10 }
 0x88e   : > { %2482 = vmatprep.mubr.f32.mxu0 %v3575_v0  ;;  %2571 = vmatprep.mubr.f32.mxu1 %v3575_v0 }
 0x891   : > { %3192 = vmatmul.mubr.msk.f32.gmra.mrb[78].mxu0 %vm570_vm2, %v3188_v11  ;;  %3196 = vmatmul.mubr.msk.f32.gmra.mrb[78].mxu1 %vm570_vm2, %v3188_v11 }
 0x892   : > { %2695 = vmatprep.mubr.f32.mxu0 %v3575_v0  ;;  %2766 = vmatprep.mubr.f32.mxu1 %v3575_v0 }
 0x958   : > { %v2466_v20 = vpop.f32.mrb[72].mxu0  ;;  %v2555_v21 = vpop.f32.mrb[72].mxu1 }
 0x959   : > { %v2578_v22 = vmul.f32 0.2, %v2466_v20  ;;  %v2580_v23 = vmul.f32 0.2, %v2555_v21  ;;  %v2468_v24 = vpop.f32.mrb[73].mxu0  ;;  %v2557_v25 = vpop.f32.mrb[73].mxu1 }
 0x95a   : > { %v2579_v26 = vmul.f32 0.2, %v2468_v24  ;;  %v2581_v27 = vmul.f32 0.2, %v2557_v25 }
 0x95b   : > { %v2594_v28 = vmax.f32 %v2466_v20, %v2578_v22  ;;  %v2596_v29 = vmax.f32 %v2555_v21, %v2580_v23 }
 0x95c   : > { %v2595_v30 = vmax.f32 %v2468_v24, %v2579_v26  ;;  %v2597_v31 = vmax.f32 %v2557_v25, %v2581_v27  ;;  %v2472_v44 = vpop.f32.mrb[74].mxu0  ;;  %v2561_v45 = vpop.f32.mrb[74].mxu1 }
 0x95d   : > { %v2582_v46 = vmul.f32 0.2, %v2472_v44  ;;  %v2584_v47 = vmul.f32 0.2, %v2561_v45  ;;  %v2474_v48 = vpop.f32.mrb[75].mxu0  ;;  %v2563_v49 = vpop.f32.mrb[75].mxu1  ;;  %v2610_v52 = vadd.f32 %v2594_v28, %v3902_v12  ;;  %v2612_v53 = vadd.f32 %v2596_v29, %v3904_v13 }
 0x95e   : > { %v2583_v50 = vmul.f32 0.2, %v2474_v48  ;;  %v2585_v51 = vmul.f32 0.2, %v2563_v49  ;;  %v2611_v56 = vadd.f32 %v2595_v30, %v3894_v6  ;;  %v2613_v57 = vadd.f32 %v2597_v31, %v3896_v7 }
 0x95f   : > { %v2598_v54 = vmax.f32 %v2472_v44, %v2582_v46  ;;  %v2600_v55 = vmax.f32 %v2561_v45, %v2584_v47 }
 0x960   : > { %v2599_v58 = vmax.f32 %v2474_v48, %v2583_v50  ;;  %v2601_v59 = vmax.f32 %v2563_v49, %v2585_v51  ;;  %v2478_v60 = vpop.f32.mrb[76].mxu0  ;;  %v2567_v61 = vpop.f32.mrb[76].mxu1 }
 0x961   : > { %v2614_v62 = vadd.f32 %v2598_v54, %v3890_v4  ;;  %v2616_v63 = vadd.f32 %v2600_v55, %v3892_v5  ;;  %v2586_v1 = vmul.f32 0.2, %v2478_v60  ;;  %v2588_v2 = vmul.f32 0.2, %v2567_v61  ;;  %v2480_v3 = vpop.f32.mrb[77].mxu0  ;;  %v2569_v12 = vpop.f32.mrb[77].mxu1 }
 0x962   : > { %v2615_v13 = vadd.f32 %v2599_v58, %v3898_v8  ;;  %v2617_v10 = vadd.f32 %v2601_v59, %v3900_v9  ;;  %v2587_v11 = vmul.f32 0.2, %v2480_v3  ;;  %v2589_v6 = vmul.f32 0.2, %v2569_v12 }
 0x963   : > { %v3351_v14 = vpack.c.bf16 %v2614_v62, %v2610_v52  ;;  %v3359_v7 = vpack.c.bf16 %v2616_v63, %v2612_v53  ;;  %v2602_v23 = vmax.f32 %v2478_v60, %v2586_v1  ;;  %v2604_v4 = vmax.f32 %v2567_v61, %v2588_v2 }
 0x964   : > { %v2484_v15 = vpop.f32.mrb[78].mxu0  ;;  %v2573_v20 = vpop.f32.mrb[78].mxu1  ;;  %v3349_v21 = vpack.c.bf16 %v2615_v13, %v2611_v56  ;;  %v3357_v22 = vpack.c.bf16 %v2617_v10, %v2613_v57  ;;  %v2603_v27 = vmax.f32 %v2480_v3, %v2587_v11  ;;  %v2605_v28 = vmax.f32 %v2569_v12, %v2589_v6 }
 0x965   : > { %v2590_v24 = vmul.f32 0.2, %v2484_v15  ;;  %v2592_v5 = vmul.f32 0.2, %v2573_v20  ;;  %v2486_v25 = vpop.f32.mrb[79].mxu0  ;;  %v2575_v26 = vpop.f32.mrb[79].mxu1  ;;  %v2618_v45 = vadd.f32 %v2602_v23, %v3938_v38  ;;  %v2620_v46 = vadd.f32 %v2604_v4, %v3940_v39 }
 0x966   : > { %v2591_v29 = vmul.f32 0.2, %v2486_v25  ;;  %v2593_v8 = vmul.f32 0.2, %v2575_v26  ;;  %3350 = vmatprep.subr.bf16.mxu0 %v3349_v21  ;;  %3358 = vmatprep.subr.bf16.mxu1 %v3357_v22  ;;  %v2619_v49 = vadd.f32 %v2603_v27, %v3930_v34  ;;  %v2621_v50 = vadd.f32 %v2605_v28, %v3932_v35 }
 0x967   : > { %v2606_v9 = vmax.f32 %v2484_v15, %v2590_v24  ;;  %v2608_v30 = vmax.f32 %v2573_v20, %v2592_v5  ;;  %3352 = vmatpush1.bf16.msra.mxu0 %v3351_v14  ;;  %3360 = vmatpush1.bf16.msra.mxu1 %v3359_v7 }
 0x968   : > { %v2607_v31 = vmax.f32 %v2486_v25, %v2591_v29  ;;  %v2609_v44 = vmax.f32 %v2575_v26, %v2593_v8 }
 0x969   : > { %v2622_v47 = vadd.f32 %v2606_v9, %v3926_v32  ;;  %v2624_v48 = vadd.f32 %v2608_v30, %v3928_v33  ;;  %v3197_v32 = vld [vmem:[%s4073_s3 + $0x4] sm:$0x7] }
 0x96a   : > { %v2623_v51 = vadd.f32 %v2607_v31, %v3934_v36  ;;  %v2625_v52 = vadd.f32 %v2609_v44, %v3936_v37 }
 0x96b   : > { %v3355_v53 = vpack.c.bf16 %v2622_v47, %v2618_v45  ;;  %v3363_v54 = vpack.c.bf16 %v2624_v48, %v2620_v46 }
 0x96c   : > { %v3353_v55 = vpack.c.bf16 %v2623_v51, %v2619_v49  ;;  %v3361_v56 = vpack.c.bf16 %v2625_v52, %v2621_v50 }
 0x96e   : > { %3354 = vmatprep.subr.bf16.mxu0 %v3353_v55  ;;  %3362 = vmatprep.subr.bf16.mxu1 %v3361_v56 }
 0x96f   : > { %3356 = vmatpush1.bf16.msra.mxu0 %v3355_v53  ;;  %3364 = vmatpush1.bf16.msra.mxu1 %v3363_v54 }
 0x970   : > { %3366 = vmatprep.subr.bf16.mxu0 %v3908_v16  ;;  %3374 = vmatprep.subr.bf16.mxu1 %v3912_v17  ;;  %v2155_v16 = vld [vmem:[%s4073_s3] sm:$0x7]  ;;  %v2922_v17 = vpop.permute.xlu0 %2921 }
 0x972   : > { %3198 = vmatmul.mubr.msk.f32.vlgmr.msra.gmra.mrb[80].mxu0 %vm570_vm2, %v3197_v32  ;;  %3199 = vmatmul.mubr.msk.f32.vlgmr.msra.gmra.mrb[80].mxu1 %vm570_vm2, %v3197_v32 }
 0x973   : > { %3368 = vmatpush1.bf16.msra.mxu0 %v3916_v18  ;;  %3376 = vmatpush1.bf16.msra.mxu1 %v3920_v19 }
 0x974   : > { %3370 = vmatprep.subr.bf16.mxu0 %v3944_v40  ;;  %3378 = vmatprep.subr.bf16.mxu1 %v3948_v41 }
 0x975   : > { %2840 = vmatprep.mubr.f32.mxu0 %v3575_v0  ;;  %2911 = vmatprep.mubr.f32.mxu1 %v3575_v0 }
 0x977   : > { %3372 = vmatpush1.bf16.msra.mxu0 %v3952_v42  ;;  %3380 = vmatpush1.bf16.msra.mxu1 %v3956_v43 }
 0x97a   : > { %3200 = vmatmul.mubr.msk.f32.vlgmr.msra.gmra.mrb[80].mxu0 %vm570_vm2, %v2155_v16  ;;  %3201 = vmatmul.mubr.msk.f32.vlgmr.msra.gmra.mrb[80].mxu1 %vm570_vm2, %v2155_v16 }
 0xa4d   : > { %v2842_v18 = vpop.f32.mrb[80].mxu0  ;;  %v2913_v19 = vpop.f32.mrb[80].mxu1 }
 0xa4e   : > { %v2924_v33 = vadd.f32 %v2922_v17, %v2842_v18  ;;  %v2926_v34 = vadd.f32 %v2922_v17, %v2913_v19  ;;  %v2844_v35 = vpop.f32.mrb[81].mxu0  ;;  %v2915_v0 = vpop.f32.mrb[81].mxu1 }
 0xa4f   : > { %v2925_v36 = vadd.f32 %v2922_v17, %v2844_v35  ;;  %v2927_v37 = vadd.f32 %v2922_v17, %v2915_v0 }
 0xa50   : > { %3466 = vtanh.f32 %v2924_v33 }
 0xa51   : > { %3468 = vtanh.f32 %v2926_v34 }
 0xa52   : > { %3470 = vtanh.f32 %v2925_v36 }
 0xa53   : > { %3472 = vtanh.f32 %v2927_v37 }
 0xa5a   : > { %v3467_v38 = vpop.eup %3466 }
 0xa5b   : > { %v3469_v39 = vpop.eup %3468 }
 0xa5c   : > { %v3471_v40 = vpop.eup %3470 }
 0xa5d   : > { %v3473_v41 = vpop.eup %3472  ;;  %v2936_v42 = vcombine.low %v3467_v38, %v3471_v40 }
 0xa5e   : > { %v2937_v43 = vcombine.low %v3469_v39, %v3473_v41 }
 0xa5f   : > { %2940 = vst [vmem:[%s322_s16] sm:$0x77] %v2936_v42 }
 0xa60   : > { %2941 = vst [vmem:[%s322_s16 + $0x8] sm:$0x77] %v2937_v43 }
 0xa61 PF: > { %s18_s25 = sadd.s32 1, %s3570_s25   ;;  %s4078_s18 = smov %s3546_s19 }
 0xa62   : > { %p15_p7 = scmp.ge.s32.totalorder %s18_s25, 6   ;;  %s4079_s19 = smov %s3550_s20 }
 0xa63   : > { %s4080_s20 = smov %s3671_s10  ;;  %s4081_s21 = smov %s3562_s23 }
 0xa64   : > { %s4082_s22 = smov %s3566_s24  ;;  %s4083_s23 = smov %s4086_s27 }
 0xa65   : > { %s4084_s24 = smov %s4090_s28  ;;  %17 = sbr.rel (!%p15_p7) target bundleno = 5 (0x5), region = 95 }
 0xa6c   :  { %2972 = vsyncpa [#allocation3], 1 }
 0xa6d   :  { %2974 = vsyncpa [#allocation3 + $0x1], 1 }

</bundles_post_ra>
